<compile_context>
chip_gen: v5e
topology: v5e:2x2
jax: 0.10.0
libtpu: 0.0.40
codegen_flags: <defaults>
</compile_context>

<pallas_src>
import functools
import inspect

import jax
import jax.numpy as jnp
from jax import lax
from jax.experimental import pallas as pl
from jax.experimental.pallas import tpu as pltpu

_MIB = 1 << 20


# --------------------------------------------------------------------------
# small math helpers
# --------------------------------------------------------------------------
def _layernorm(h, w, b, eps=1e-5):
    # Centered two-pass variance: robust when |mean| >> std (review item).
    mu = jnp.mean(h, axis=-1, keepdims=True)
    hc = h - mu
    var = jnp.mean(hc * hc, axis=-1, keepdims=True)
    return hc * lax.rsqrt(var + eps) * w + b


def _gelu_exact(y):
    # PyTorch nn.GELU default = exact (erf) GELU.
    return 0.5 * y * (1.0 + lax.erf(y * (2.0 ** -0.5)))


# --------------------------------------------------------------------------
# feature probe: is pl.Buffered(1) (single-buffered input blocks) supported?
# Isolated tiny kernel so a failure here never masks errors in the real one.
# --------------------------------------------------------------------------
_BUFFERED_OK = None


def _probe_copy_kernel(x_ref, o_ref):
    o_ref[...] = x_ref[...]


def _buffered_supported():
    global _BUFFERED_OK
    if _BUFFERED_OK is not None:
        return _BUFFERED_OK
    ok = hasattr(pl, "Buffered")
    if ok:
        try:
            ok = "pipeline_mode" in inspect.signature(pl.BlockSpec).parameters
        except (TypeError, ValueError):
            ok = False
    if ok:
        try:
            fn = pl.pallas_call(
                _probe_copy_kernel,
                out_shape=jax.ShapeDtypeStruct((16, 128), jnp.float32),
                grid_spec=pltpu.PrefetchScalarGridSpec(
                    num_scalar_prefetch=0,
                    grid=(2,),
                    in_specs=[pl.BlockSpec((8, 128), lambda i: (i, 0),
                                           pipeline_mode=pl.Buffered(1))],
                    out_specs=pl.BlockSpec((8, 128), lambda i: (i, 0)),
                ),
            )
            jax.block_until_ready(fn(jnp.zeros((16, 128), jnp.float32)))
        except Exception:  # probe only — the real kernel never falls through here
            ok = False
    _BUFFERED_OK = ok
    return ok


# --------------------------------------------------------------------------
# VMEM budgeting
# --------------------------------------------------------------------------
def _physical_vmem_bytes():
    try:
        info = pltpu.get_tpu_info()
        v = getattr(info, "vmem_capacity_bytes", None)
        if v:
            return int(v)
    except Exception:
        pass
    return 64 * _MIB  # conservative (v7x per-TensorCore VMEM)


def _ru(v, m):
    return -(-v // m) * m


def _block_bytes(shape, dtype_bytes, sublane, nbuf):
    # VMEM footprint of one pipelined block: last dim lane-padded to 128,
    # second-to-last sublane-padded, leading dims multiplied out.
    *lead, s, l = shape
    n = 1
    for d in lead:
        n *= d
    return nbuf * n * _ru(max(s, 1), sublane) * _ru(max(l, 1), 128) * dtype_bytes


def _vmem_estimate(tile_q, *, N, C, Hm, H, hd, kv_buf, w_buf, attn_bytes, emit_attn):
    bf, f32 = 2, 4
    total = 0
    total += _block_bytes((1, tile_q, C), f32, 8, 2)              # x tile
    total += _block_bytes((1, H, tile_q, hd), bf, 16, 2)          # q tile
    total += 2 * _block_bytes((1, H, N, hd), bf, 16, kv_buf)      # k, v (full seq)
    total += _block_bytes((C, C), bf, 16, w_buf)                  # wp
    total += _block_bytes((C, Hm), bf, 16, w_buf)                 # w1
    total += _block_bytes((Hm, C), bf, 16, w_buf)                 # w2
    total += 5 * _block_bytes((1, max(C, Hm)), f32, 8, w_buf)     # biases / ln params
    total += _block_bytes((1, tile_q, C), f32, 8, 2)              # features out
    if emit_attn:
        sub = 16 if attn_bytes == 2 else 8
        total += _block_bytes((1, H, tile_q, N), attn_bytes, sub, 2)  # attn out
    total += _block_bytes((tile_q, C), bf, 16, 1)                 # ao scratch
    return total


def _pick_tile_q(N, budget, est_fn):
    cands = [c for c in (1024, 512, 256, 128) if c <= N and N % c == 0]
    if N <= 1024 and N not in cands:
        cands.append(N)
    if not cands:
        cands = [N]
    cands = sorted(set(cands), reverse=True)
    for c in cands:
        if est_fn(c) <= budget:
            return c
    return cands[-1]  # smallest candidate; best effort if nothing fits the budget


# --------------------------------------------------------------------------
# kernel body
# --------------------------------------------------------------------------
def _block_body(x_ref, q_ref, k_ref, v_ref,
                wp_ref, bp_ref, ln2_w_ref, ln2_b_ref,
                w1_ref, b1_ref, w2_ref, b2_ref,
                out_ref, attn_ref, ao_ref,
                *, num_heads, head_dim):
    f32 = jnp.float32
    bf16 = jnp.bfloat16

    xt = x_ref[0].astype(f32)                                    # (TQ, C)

    # ---- multi-head attention for this query tile (K/V = full sequence) ----
    for h in range(num_heads):                                   # static unroll
        qh = q_ref[0, h]                                         # (TQ, hd) bf16, pre-scaled
        kh = k_ref[0, h]                                         # (N,  hd) bf16
        vh = v_ref[0, h]                                         # (N,  hd) bf16
        # q @ k^T without an explicit transpose: contract the last dims.
        logits = lax.dot_general(qh, kh, (((1,), (1,)), ((), ())),
                                 preferred_element_type=f32)     # (TQ, N) f32
        logits = logits - jnp.max(logits, axis=-1, keepdims=True)
        e = jnp.exp(logits)
        # approx reciprocal -> rows sum to 1 only to ~1e-3 rel; fine for bf16 attn.
        a = e * pl.reciprocal(jnp.sum(e, axis=-1, keepdims=True), approx=True)
        if attn_ref is not None:
            attn_ref[0, h] = a.astype(attn_ref.dtype)
        o_h = jnp.dot(a.astype(bf16), vh, preferred_element_type=f32)
        # store head output at its lane offset; keeps wp matmul full-C contraction
        ao_ref[:, h * head_dim:(h + 1) * head_dim] = o_h.astype(bf16)

    proj = (jnp.dot(ao_ref[...], wp_ref[...], preferred_element_type=f32)
            + bp_ref[...])
    x2 = xt + proj                                               # residual (skip_attn=True)

    # ---- norm2 + MLP (Linear -> GELU -> Linear) + residual ----
    h2 = _layernorm(x2, ln2_w_ref[...], ln2_b_ref[...]).astype(bf16)
    hidden = jnp.dot(h2, w1_ref[...], preferred_element_type=f32) + b1_ref[...]
    hidden = _gelu_exact(hidden).astype(bf16)
    embed = jnp.dot(hidden, w2_ref[...], preferred_element_type=f32) + b2_ref[...]

    out_ref[0] = (x2 + embed).astype(out_ref.dtype)


def _make_kernel(num_heads, head_dim, emit_attn):
    if emit_attn:
        def kernel(x_ref, q_ref, k_ref, v_ref, wp_ref, bp_ref, ln2w, ln2b,
                   w1, b1, w2, b2, out_ref, attn_ref, ao_ref):
            _block_body(x_ref, q_ref, k_ref, v_ref, wp_ref, bp_ref, ln2w, ln2b,
                        w1, b1, w2, b2, out_ref, attn_ref, ao_ref,
                        num_heads=num_heads, head_dim=head_dim)
    else:
        def kernel(x_ref, q_ref, k_ref, v_ref, wp_ref, bp_ref, ln2w, ln2b,
                   w1, b1, w2, b2, out_ref, ao_ref):
            _block_body(x_ref, q_ref, k_ref, v_ref, wp_ref, bp_ref, ln2w, ln2b,
                        w1, b1, w2, b2, out_ref, None, ao_ref,
                        num_heads=num_heads, head_dim=head_dim)
    return kernel


# --------------------------------------------------------------------------
# wrapper
# --------------------------------------------------------------------------
def block_forward(x, params, *, num_heads, tile_q=None,
                  attn_dtype=jnp.bfloat16, return_attn=True):
    B, N, C = x.shape
    Hm = params["w1"].shape[1]
    assert C % num_heads == 0, "dim should be divisible by num_heads"
    hd = C // num_heads
    bf16, f32 = jnp.bfloat16, jnp.float32

    single_buf = _buffered_supported()
    kv_buf = 1 if single_buf else 2
    w_buf = 1 if single_buf else 2

    # Per-chip VMEM budget (review item): ~100 MiB on 128 MiB chips (v5e/v6e),
    # physical - 12 MiB headroom on v7x (64 MiB per TensorCore).
    phys = _physical_vmem_bytes()
    if phys >= 128 * _MIB:
        vmem_limit = 100 * _MIB
    else:
        vmem_limit = max(phys - 12 * _MIB, 32 * _MIB)
    budget = vmem_limit - 6 * _MIB  # compiler-internal scratch / semaphore headroom

    attn_bytes = jnp.dtype(attn_dtype).itemsize
    est = functools.partial(_vmem_estimate, N=N, C=C, Hm=Hm, H=num_heads, hd=hd,
                            kv_buf=kv_buf, w_buf=w_buf, attn_bytes=attn_bytes,
                            emit_attn=return_attn)
    if tile_q is None:
        tile_q = _pick_tile_q(N, budget, est)
    assert N % tile_q == 0, "tile_q must divide the sequence length"
    num_q_tiles = N // tile_q
    # TODO(synk): if N is not a multiple of 128, the attn writeback uses masked
    # partial stores; pad the sequence (with -inf key masking) in the caller.

    # ---- XLA pre-pass: LayerNorm1 + Q/K/V projections, head-major bf16 ----
    xf = x.astype(f32)
    h1 = _layernorm(xf, params["ln1_w"].astype(f32), params["ln1_b"].astype(f32))
    h1b = h1.astype(bf16)
    scale = hd ** (-0.5)

    def _proj(w, s=1.0):
        y = jnp.einsum("bnc,cd->bnd", h1b, w.astype(bf16),
                       preferred_element_type=f32) * s
        return y.reshape(B, N, num_heads, hd).transpose(0, 2, 1, 3).astype(bf16)

    q = _proj(params["wq"], scale)          # (B, H, N, hd), pre-scaled
    k = _proj(params["wk"])                 # (B, H, N, hd)
    v = _proj(params["wv"])                 # (B, H, N, hd)

    def const_spec(shape):
        ndim = len(shape)
        idx = lambda b, t, _n=ndim: (0,) * _n
        if single_buf:
            return pl.BlockSpec(shape, idx, pipeline_mode=pl.Buffered(1))
        return pl.BlockSpec(shape, idx)

    def kv_spec():
        idx = lambda b, t: (b, 0, 0, 0)
        shape = (1, num_heads, N, hd)
        if single_buf:
            return pl.BlockSpec(shape, idx, pipeline_mode=pl.Buffered(1))
        return pl.BlockSpec(shape, idx)

    in_specs = [
        pl.BlockSpec((1, tile_q, C), lambda b, t: (b, t, 0)),                  # x
        pl.BlockSpec((1, num_heads, tile_q, hd), lambda b, t: (b, 0, t, 0)),   # q
        kv_spec(),                                                             # k
        kv_spec(),                                                             # v
        const_spec((C, C)),       # wp
        const_spec((1, C)),       # bp
        const_spec((1, C)),       # ln2_w
        const_spec((1, C)),       # ln2_b
        const_spec((C, Hm)),      # w1
        const_spec((1, Hm)),      # b1
        const_spec((Hm, C)),      # w2
        const_spec((1, C)),       # b2
    ]
    feat_spec = pl.BlockSpec((1, tile_q, C), lambda b, t: (b, t, 0))
    if return_attn:
        out_specs = (feat_spec,
                     pl.BlockSpec((1, num_heads, tile_q, N),
                                  lambda b, t: (b, 0, t, 0)))
        out_shape = (jax.ShapeDtypeStruct((B, N, C), x.dtype),
                     jax.ShapeDtypeStruct((B, num_heads, N, N), attn_dtype))
    else:
        out_specs = feat_spec
        out_shape = jax.ShapeDtypeStruct((B, N, C), x.dtype)

    kernel = _make_kernel(num_heads, hd, return_attn)

    fn = pl.pallas_call(
        kernel,
        out_shape=out_shape,
        grid_spec=pltpu.PrefetchScalarGridSpec(
            num_scalar_prefetch=0,
            grid=(B, num_q_tiles),
            in_specs=in_specs,
            out_specs=out_specs,
            scratch_shapes=[pltpu.VMEM((tile_q, C), bf16)],   # attention-out staging
        ),
        compiler_params=pltpu.CompilerParams(
            # no cross-iteration scratch dependency any more -> both axes parallel
            dimension_semantics=("parallel", "parallel"),
            vmem_limit_bytes=int(vmem_limit),
        ),
    )
    args = (x, q, k, v,
            params["wp"].astype(bf16), params["bp"].astype(f32),
            params["ln2_w"].astype(f32), params["ln2_b"].astype(f32),
            params["w1"].astype(bf16), params["b1"].astype(f32),
            params["w2"].astype(bf16), params["b2"].astype(f32))
    return fn(*args)


# --------------------------------------------------------------------------
# pure-JAX f32 reference (matches the PyTorch Block with default config)
# --------------------------------------------------------------------------
def reference_forward(x, params, *, num_heads):
    B, N, C = x.shape
    hd = C // num_heads

    def ln(h, w, b):
        mu = jnp.mean(h, axis=-1, keepdims=True)
        var = jnp.mean((h - mu) ** 2, axis=-1, keepdims=True)
        return (h - mu) * lax.rsqrt(var + 1e-5) * w + b

    h1 = ln(x, params["ln1_w"], params["ln1_b"])
    q = (h1 @ params["wq"]).reshape(B, N, num_heads, hd).transpose(0, 2, 1, 3)
    k = (h1 @ params["wk"]).reshape(B, N, num_heads, hd).transpose(0, 2, 1, 3)
    v = (h1 @ params["wv"]).reshape(B, N, num_heads, hd).transpose(0, 2, 1, 3)
    q = q * hd ** (-0.5)
    attn = jax.nn.softmax(jnp.einsum("bhqd,bhkd->bhqk", q, k), axis=-1)
    o = jnp.einsum("bhqk,bhkd->bhqd", attn, v).transpose(0, 2, 1, 3).reshape(B, N, C)
    o = o @ params["wp"] + params["bp"]
    x2 = x + o
    h2 = ln(x2, params["ln2_w"], params["ln2_b"])
    m = (jax.nn.gelu(h2 @ params["w1"] + params["b1"], approximate=False)
         @ params["w2"] + params["b2"])
    return x2 + m, attn


if __name__ == "__main__":
    # Small shapes consistent with the module (dim divisible by num_heads).
    B, N, C = 2, 8, 32
    num_heads = 4
    mlp_ratio = 4.0
    Hm = int(C * mlp_ratio)

    key = jax.random.PRNGKey(0)
    keys = jax.random.split(key, 14)

    params = {
        "ln1_w": 1.0 + 0.1 * jax.random.normal(keys[10], (1, C), jnp.float32),
        "ln1_b": 0.05 * jax.random.normal(keys[11], (1, C), jnp.float32),
        "wq": 0.05 * jax.random.normal(keys[0], (C, C), jnp.float32),
        "wk": 0.05 * jax.random.normal(keys[1], (C, C), jnp.float32),
        "wv": 0.05 * jax.random.normal(keys[2], (C, C), jnp.float32),
        "wp": 0.05 * jax.random.normal(keys[3], (C, C), jnp.float32),
        "bp": 0.01 * jax.random.normal(keys[4], (1, C), jnp.float32),
        "ln2_w": 1.0 + 0.1 * jax.random.normal(keys[12], (1, C), jnp.float32),
        "ln2_b": 0.05 * jax.random.normal(keys[13], (1, C), jnp.float32),
        "w1": 0.05 * jax.random.normal(keys[5], (C, Hm), jnp.float32),
        "b1": 0.01 * jax.random.normal(keys[6], (1, Hm), jnp.float32),
        "w2": 0.05 * jax.random.normal(keys[7], (Hm, C), jnp.float32),
        "b2": 0.01 * jax.random.normal(keys[8], (1, C), jnp.float32),
    }

    x = jax.random.normal(keys[9], (B, N, C), jnp.float32)

    features, attn = block_forward(x, params, num_heads=num_heads)
    features = jax.block_until_ready(features)
    attn = jax.block_until_ready(attn)

    ref_features, ref_attn = reference_forward(x, params, num_heads=num_heads)
    # bf16 matmul operands / bf16 attn output -> compare at bf16-level tolerance.
    assert jnp.allclose(features, ref_features, atol=2e-2, rtol=2e-2), "features mismatch"
    assert jnp.allclose(attn.astype(jnp.float32), ref_attn, atol=2e-2, rtol=2e-2), "attn mismatch"

    print("KERNEL_OK")
</pallas_src>

<mosaic_0001>
module attributes {stable_mosaic.version = 11 : i64} {
  func.func @_probe_copy_kernel(%arg0: i32, %arg1: memref<8x128xf32, #tpu.memory_space<vmem>>, %arg2: memref<8x128xf32, #tpu.memory_space<vmem>>) attributes {dimension_semantics = [#tpu.dimension_semantics<arbitrary>], iteration_bounds = array<i64: 2>, scalar_prefetch = 0 : i64, scratch_operands = 0 : i64, tpu.core_type = #tpu.core_type<tc>, window_params = [{pipeline_mode = #tpu.pipeline_mode<synchronous>, transform_indices = @transform_0, window_bounds = array<i64: 8, 128>}, {transform_indices = @transform_1, window_bounds = array<i64: 8, 128>}]} {
    %c0 = arith.constant 0 : index
    %c0_0 = arith.constant 0 : index
    %0 = vector.load %arg1[%c0, %c0_0] : memref<8x128xf32, #tpu.memory_space<vmem>>, vector<8x128xf32>
    %c0_1 = arith.constant 0 : index
    %c0_2 = arith.constant 0 : index
    %1 = vector.load %arg2[%c0_1, %c0_2] : memref<8x128xf32, #tpu.memory_space<vmem>>, vector<8x128xf32>
    tpu.vector_store %arg2[%c0_1, %c0_2], %0 {strides = array<i32>} : memref<8x128xf32, #tpu.memory_space<vmem>>, vector<8x128xf32>,
    return
  }
  func.func @transform_0(%arg0: i32) -> (i32, i32) {
    %c0_i32 = arith.constant 0 : i32
    %c0_i32_0 = arith.constant 0 : i32
    return %arg0, %c0_i32 : i32, i32
  }
  func.func @transform_1(%arg0: i32) -> (i32, i32) {
    %c0_i32 = arith.constant 0 : i32
    %c0_i32_0 = arith.constant 0 : i32
    return %arg0, %c0_i32 : i32, i32
  }
}

module attributes {stable_mosaic.version = 11 : i64} {
  func.func @kernel(%arg0: i32, %arg1: i32, %arg2: memref<1x8x32xf32, #tpu.memory_space<vmem>>, %arg3: memref<1x4x8x8xbf16, #tpu.memory_space<vmem>>, %arg4: memref<1x4x8x8xbf16, #tpu.memory_space<vmem>>, %arg5: memref<1x4x8x8xbf16, #tpu.memory_space<vmem>>, %arg6: memref<32x32xbf16, #tpu.memory_space<vmem>>, %arg7: memref<1x32xf32, #tpu.memory_space<vmem>>, %arg8: memref<1x32xf32, #tpu.memory_space<vmem>>, %arg9: memref<1x32xf32, #tpu.memory_space<vmem>>, %arg10: memref<32x128xbf16, #tpu.memory_space<vmem>>, %arg11: memref<1x128xf32, #tpu.memory_space<vmem>>, %arg12: memref<128x32xbf16, #tpu.memory_space<vmem>>, %arg13: memref<1x32xf32, #tpu.memory_space<vmem>>, %arg14: memref<1x8x32xf32, #tpu.memory_space<vmem>>, %arg15: memref<1x4x8x8xbf16, #tpu.memory_space<vmem>>, %arg16: memref<8x32xbf16, #tpu.memory_space<vmem>>) attributes {dimension_semantics = [#tpu.dimension_semantics<parallel>, #tpu.dimension_semantics<parallel>], iteration_bounds = array<i64: 2, 1>, scalar_prefetch = 0 : i64, scratch_operands = 1 : i64, tpu.core_type = #tpu.core_type<tc>, window_params = [{transform_indices = @transform_0, window_bounds = array<i64: 1, 8, 32>}, {transform_indices = @transform_1, window_bounds = array<i64: 1, 4, 8, 8>}, {transform_indices = @transform_2, window_bounds = array<i64: 1, 4, 8, 8>}, {transform_indices = @transform_3, window_bounds = array<i64: 1, 4, 8, 8>}, {pipeline_mode = #tpu.pipeline_mode<synchronous>, transform_indices = @transform_4, window_bounds = array<i64: 32, 32>}, {pipeline_mode = #tpu.pipeline_mode<synchronous>, transform_indices = @transform_5, window_bounds = array<i64: 1, 32>}, {pipeline_mode = #tpu.pipeline_mode<synchronous>, transform_indices = @transform_6, window_bounds = array<i64: 1, 32>}, {pipeline_mode = #tpu.pipeline_mode<synchronous>, transform_indices = @transform_7, window_bounds = array<i64: 1, 32>}, {pipeline_mode = #tpu.pipeline_mode<synchronous>, transform_indices = @transform_8, window_bounds = array<i64: 32, 128>}, {pipeline_mode = #tpu.pipeline_mode<synchronous>, transform_indices = @transform_9, window_bounds = array<i64: 1, 128>}, {pipeline_mode = #tpu.pipeline_mode<synchronous>, transform_indices = @transform_10, window_bounds = array<i64: 128, 32>}, {pipeline_mode = #tpu.pipeline_mode<synchronous>, transform_indices = @transform_11, window_bounds = array<i64: 1, 32>}, {transform_indices = @transform_12, window_bounds = array<i64: 1, 8, 32>}, {transform_indices = @transform_13, window_bounds = array<i64: 1, 4, 8, 8>}]} {
    %c0 = arith.constant 0 : index
    %c0_0 = arith.constant 0 : index
    %c0_1 = arith.constant 0 : index
    %0 = vector.load %arg2[%c0, %c0_0, %c0_1] : memref<1x8x32xf32, #tpu.memory_space<vmem>>, vector<1x8x32xf32>
    %1 = vector.shape_cast %0 : vector<1x8x32xf32> to vector<8x32xf32>
    %c0_2 = arith.constant 0 : index
    %c0_3 = arith.constant 0 : index
    %c0_4 = arith.constant 0 : index
    %c0_5 = arith.constant 0 : index
    %2 = vector.load %arg3[%c0_2, %c0_3, %c0_4, %c0_5] : memref<1x4x8x8xbf16, #tpu.memory_space<vmem>>, vector<1x1x8x8xbf16>
    %3 = vector.shape_cast %2 : vector<1x1x8x8xbf16> to vector<8x8xbf16>
    %c0_6 = arith.constant 0 : index
    %c0_7 = arith.constant 0 : index
    %c0_8 = arith.constant 0 : index
    %c0_9 = arith.constant 0 : index
    %4 = vector.load %arg4[%c0_6, %c0_7, %c0_8, %c0_9] : memref<1x4x8x8xbf16, #tpu.memory_space<vmem>>, vector<1x1x8x8xbf16>
    %5 = vector.shape_cast %4 : vector<1x1x8x8xbf16> to vector<8x8xbf16>
    %c0_10 = arith.constant 0 : index
    %c0_11 = arith.constant 0 : index
    %c0_12 = arith.constant 0 : index
    %c0_13 = arith.constant 0 : index
    %6 = vector.load %arg5[%c0_10, %c0_11, %c0_12, %c0_13] : memref<1x4x8x8xbf16, #tpu.memory_space<vmem>>, vector<1x1x8x8xbf16>
    %7 = vector.shape_cast %6 : vector<1x1x8x8xbf16> to vector<8x8xbf16>
    %cst = arith.constant dense<0.000000e+00> : vector<8x8xf32>
    %8 = tpu.matmul %3, %5, %cst {dimension_numbers = #tpu.dot_dimension_numbers<[1], [1], [0], [0], [0, 0, 1, 0], [], []>} : vector<8x8xbf16>, vector<8x8xbf16>, vector<8x8xf32> -> vector<8x8xf32>
    %cst_14 = arith.constant dense<0xFF800000> : vector<8xf32>
    %9 = vector.multi_reduction <maximumf>, %8, %cst_14 [1] : vector<8x8xf32> to vector<8xf32>
    %10 = vector.shape_cast %9 : vector<8xf32> to vector<8x1xf32>
    %11 = vector.broadcast %10 : vector<8x1xf32> to vector<8x8xf32>
    %12 = arith.subf %8, %11 : vector<8x8xf32>
    %13 = math.exp %12 : vector<8x8xf32>
    %cst_15 = arith.constant dense<0.000000e+00> : vector<8xf32>
    %14 = vector.multi_reduction <add>, %13, %cst_15 [1] : vector<8x8xf32> to vector<8xf32>
    %15 = vector.shape_cast %14 : vector<8xf32> to vector<8x1xf32>
    %16 = tpu.reciprocal %15 {approx = true} : vector<8x1xf32> -> vector<8x1xf32>
    %17 = vector.broadcast %16 : vector<8x1xf32> to vector<8x8xf32>
    %18 = arith.mulf %13, %17 : vector<8x8xf32>
    %19 = arith.truncf %18 : vector<8x8xf32> to vector<8x8xbf16>
    %c0_16 = arith.constant 0 : index
    %c0_17 = arith.constant 0 : index
    %c0_18 = arith.constant 0 : index
    %c0_19 = arith.constant 0 : index
    %20 = vector.load %arg15[%c0_16, %c0_17, %c0_18, %c0_19] : memref<1x4x8x8xbf16, #tpu.memory_space<vmem>>, vector<1x1x8x8xbf16>
    %21 = vector.shape_cast %20 : vector<1x1x8x8xbf16> to vector<8x8xbf16>
    %22 = vector.shape_cast %19 : vector<8x8xbf16> to vector<1x1x8x8xbf16>
    tpu.vector_store %arg15[%c0_16, %c0_17, %c0_18, %c0_19], %22 {strides = array<i32>} : memref<1x4x8x8xbf16, #tpu.memory_space<vmem>>, vector<1x1x8x8xbf16>,
    %23 = arith.truncf %18 : vector<8x8xf32> to vector<8x8xbf16>
    %cst_20 = arith.constant dense<0.000000e+00> : vector<8x8xf32>
    %24 = tpu.matmul %23, %7, %cst_20 {dimension_numbers = #tpu.dot_dimension_numbers<[1], [0], [0], [1], [0, 0, 1, 1], [], []>} : vector<8x8xbf16>, vector<8x8xbf16>, vector<8x8xf32> -> vector<8x8xf32>
    %25 = arith.truncf %24 : vector<8x8xf32> to vector<8x8xbf16>
    %c0_21 = arith.constant 0 : index
    %c0_22 = arith.constant 0 : index
    %26 = vector.load %arg16[%c0_21, %c0_22] : memref<8x32xbf16, #tpu.memory_space<vmem>>, vector<8x8xbf16>
    tpu.vector_store %arg16[%c0_21, %c0_22], %25 {strides = array<i32>} : memref<8x32xbf16, #tpu.memory_space<vmem>>, vector<8x8xbf16>,
    %c0_23 = arith.constant 0 : index
    %c1 = arith.constant 1 : index
    %c0_24 = arith.constant 0 : index
    %c0_25 = arith.constant 0 : index
    %27 = vector.load %arg3[%c0_23, %c1, %c0_24, %c0_25] : memref<1x4x8x8xbf16, #tpu.memory_space<vmem>>, vector<1x1x8x8xbf16>
    %28 = vector.shape_cast %27 : vector<1x1x8x8xbf16> to vector<8x8xbf16>
    %c0_26 = arith.constant 0 : index
    %c1_27 = arith.constant 1 : index
    %c0_28 = arith.constant 0 : index
    %c0_29 = arith.constant 0 : index
    %29 = vector.load %arg4[%c0_26, %c1_27, %c0_28, %c0_29] : memref<1x4x8x8xbf16, #tpu.memory_space<vmem>>, vector<1x1x8x8xbf16>
    %30 = vector.shape_cast %29 : vector<1x1x8x8xbf16> to vector<8x8xbf16>
    %c0_30 = arith.constant 0 : index
    %c1_31 = arith.constant 1 : index
    %c0_32 = arith.constant 0 : index
    %c0_33 = arith.constant 0 : index
    %31 = vector.load %arg5[%c0_30, %c1_31, %c0_32, %c0_33] : memref<1x4x8x8xbf16, #tpu.memory_space<vmem>>, vector<1x1x8x8xbf16>
    %32 = vector.shape_cast %31 : vector<1x1x8x8xbf16> to vector<8x8xbf16>
    %cst_34 = arith.constant dense<0.000000e+00> : vector<8x8xf32>
    %33 = tpu.matmul %28, %30, %cst_34 {dimension_numbers = #tpu.dot_dimension_numbers<[1], [1], [0], [0], [0, 0, 1, 0], [], []>} : vector<8x8xbf16>, vector<8x8xbf16>, vector<8x8xf32> -> vector<8x8xf32>
    %cst_35 = arith.constant dense<0xFF800000> : vector<8xf32>
    %34 = vector.multi_reduction <maximumf>, %33, %cst_35 [1] : vector<8x8xf32> to vector<8xf32>
    %35 = vector.shape_cast %34 : vector<8xf32> to vector<8x1xf32>
    %36 = vector.broadcast %35 : vector<8x1xf32> to vector<8x8xf32>
    %37 = arith.subf %33, %36 : vector<8x8xf32>
    %38 = math.exp %37 : vector<8x8xf32>
    %cst_36 = arith.constant dense<0.000000e+00> : vector<8xf32>
    %39 = vector.multi_reduction <add>, %38, %cst_36 [1] : vector<8x8xf32> to vector<8xf32>
    %40 = vector.shape_cast %39 : vector<8xf32> to vector<8x1xf32>
    %41 = tpu.reciprocal %40 {approx = true} : vector<8x1xf32> -> vector<8x1xf32>
    %42 = vector.broadcast %41 : vector<8x1xf32> to vector<8x8xf32>
    %43 = arith.mulf %38, %42 : vector<8x8xf32>
    %44 = arith.truncf %43 : vector<8x8xf32> to vector<8x8xbf16>
    %c0_37 = arith.constant 0 : index
    %c1_38 = arith.constant 1 : index
    %c0_39 = arith.constant 0 : index
    %c0_40 = arith.constant 0 : index
    %45 = vector.load %arg15[%c0_37, %c1_38, %c0_39, %c0_40] : memref<1x4x8x8xbf16, #tpu.memory_space<vmem>>, vector<1x1x8x8xbf16>
    %46 = vector.shape_cast %45 : vector<1x1x8x8xbf16> to vector<8x8xbf16>
    %47 = vector.shape_cast %44 : vector<8x8xbf16> to vector<1x1x8x8xbf16>
    tpu.vector_store %arg15[%c0_37, %c1_38, %c0_39, %c0_40], %47 {strides = array<i32>} : memref<1x4x8x8xbf16, #tpu.memory_space<vmem>>, vector<1x1x8x8xbf16>,
    %48 = arith.truncf %43 : vector<8x8xf32> to vector<8x8xbf16>
    %cst_41 = arith.constant dense<0.000000e+00> : vector<8x8xf32>
    %49 = tpu.matmul %48, %32, %cst_41 {dimension_numbers = #tpu.dot_dimension_numbers<[1], [0], [0], [1], [0, 0, 1, 1], [], []>} : vector<8x8xbf16>, vector<8x8xbf16>, vector<8x8xf32> -> vector<8x8xf32>
    %50 = arith.truncf %49 : vector<8x8xf32> to vector<8x8xbf16>
    %c0_42 = arith.constant 0 : index
    %c8 = arith.constant 8 : index
    %51 = vector.load %arg16[%c0_42, %c8] : memref<8x32xbf16, #tpu.memory_space<vmem>>, vector<8x8xbf16>
    tpu.vector_store %arg16[%c0_42, %c8], %50 {strides = array<i32>} : memref<8x32xbf16, #tpu.memory_space<vmem>>, vector<8x8xbf16>,
    %c0_43 = arith.constant 0 : index
    %c2 = arith.constant 2 : index
    %c0_44 = arith.constant 0 : index
    %c0_45 = arith.constant 0 : index
    %52 = vector.load %arg3[%c0_43, %c2, %c0_44, %c0_45] : memref<1x4x8x8xbf16, #tpu.memory_space<vmem>>, vector<1x1x8x8xbf16>
    %53 = vector.shape_cast %52 : vector<1x1x8x8xbf16> to vector<8x8xbf16>
    %c0_46 = arith.constant 0 : index
    %c2_47 = arith.constant 2 : index
    %c0_48 = arith.constant 0 : index
    %c0_49 = arith.constant 0 : index
    %54 = vector.load %arg4[%c0_46, %c2_47, %c0_48, %c0_49] : memref<1x4x8x8xbf16, #tpu.memory_space<vmem>>, vector<1x1x8x8xbf16>
    %55 = vector.shape_cast %54 : vector<1x1x8x8xbf16> to vector<8x8xbf16>
    %c0_50 = arith.constant 0 : index
    %c2_51 = arith.constant 2 : index
    %c0_52 = arith.constant 0 : index
    %c0_53 = arith.constant 0 : index
    %56 = vector.load %arg5[%c0_50, %c2_51, %c0_52, %c0_53] : memref<1x4x8x8xbf16, #tpu.memory_space<vmem>>, vector<1x1x8x8xbf16>
    %57 = vector.shape_cast %56 : vector<1x1x8x8xbf16> to vector<8x8xbf16>
    %cst_54 = arith.constant dense<0.000000e+00> : vector<8x8xf32>
    %58 = tpu.matmul %53, %55, %cst_54 {dimension_numbers = #tpu.dot_dimension_numbers<[1], [1], [0], [0], [0, 0, 1, 0], [], []>} : vector<8x8xbf16>, vector<8x8xbf16>, vector<8x8xf32> -> vector<8x8xf32>
    %cst_55 = arith.constant dense<0xFF800000> : vector<8xf32>
    %59 = vector.multi_reduction <maximumf>, %58, %cst_55 [1] : vector<8x8xf32> to vector<8xf32>
    %60 = vector.shape_cast %59 : vector<8xf32> to vector<8x1xf32>
    %61 = vector.broadcast %60 : vector<8x1xf32> to vector<8x8xf32>
    %62 = arith.subf %58, %61 : vector<8x8xf32>
    %63 = math.exp %62 : vector<8x8xf32>
    %cst_56 = arith.constant dense<0.000000e+00> : vector<8xf32>
    %64 = vector.multi_reduction <add>, %63, %cst_56 [1] : vector<8x8xf32> to vector<8xf32>
    %65 = vector.shape_cast %64 : vector<8xf32> to vector<8x1xf32>
    %66 = tpu.reciprocal %65 {approx = true} : vector<8x1xf32> -> vector<8x1xf32>
    %67 = vector.broadcast %66 : vector<8x1xf32> to vector<8x8xf32>
    %68 = arith.mulf %63, %67 : vector<8x8xf32>
    %69 = arith.truncf %68 : vector<8x8xf32> to vector<8x8xbf16>
    %c0_57 = arith.constant 0 : index
    %c2_58 = arith.constant 2 : index
    %c0_59 = arith.constant 0 : index
    %c0_60 = arith.constant 0 : index
    %70 = vector.load %arg15[%c0_57, %c2_58, %c0_59, %c0_60] : memref<1x4x8x8xbf16, #tpu.memory_space<vmem>>, vector<1x1x8x8xbf16>
    %71 = vector.shape_cast %70 : vector<1x1x8x8xbf16> to vector<8x8xbf16>
    %72 = vector.shape_cast %69 : vector<8x8xbf16> to vector<1x1x8x8xbf16>
    tpu.vector_store %arg15[%c0_57, %c2_58, %c0_59, %c0_60], %72 {strides = array<i32>} : memref<1x4x8x8xbf16, #tpu.memory_space<vmem>>, vector<1x1x8x8xbf16>,
    %73 = arith.truncf %68 : vector<8x8xf32> to vector<8x8xbf16>
    %cst_61 = arith.constant dense<0.000000e+00> : vector<8x8xf32>
    %74 = tpu.matmul %73, %57, %cst_61 {dimension_numbers = #tpu.dot_dimension_numbers<[1], [0], [0], [1], [0, 0, 1, 1], [], []>} : vector<8x8xbf16>, vector<8x8xbf16>, vector<8x8xf32> -> vector<8x8xf32>
    %75 = arith.truncf %74 : vector<8x8xf32> to vector<8x8xbf16>
    %c0_62 = arith.constant 0 : index
    %c16 = arith.constant 16 : index
    %76 = vector.load %arg16[%c0_62, %c16] : memref<8x32xbf16, #tpu.memory_space<vmem>>, vector<8x8xbf16>
    tpu.vector_store %arg16[%c0_62, %c16], %75 {strides = array<i32>} : memref<8x32xbf16, #tpu.memory_space<vmem>>, vector<8x8xbf16>,
    %c0_63 = arith.constant 0 : index
    %c3 = arith.constant 3 : index
    %c0_64 = arith.constant 0 : index
    %c0_65 = arith.constant 0 : index
    %77 = vector.load %arg3[%c0_63, %c3, %c0_64, %c0_65] : memref<1x4x8x8xbf16, #tpu.memory_space<vmem>>, vector<1x1x8x8xbf16>
    %78 = vector.shape_cast %77 : vector<1x1x8x8xbf16> to vector<8x8xbf16>
    %c0_66 = arith.constant 0 : index
    %c3_67 = arith.constant 3 : index
    %c0_68 = arith.constant 0 : index
    %c0_69 = arith.constant 0 : index
    %79 = vector.load %arg4[%c0_66, %c3_67, %c0_68, %c0_69] : memref<1x4x8x8xbf16, #tpu.memory_space<vmem>>, vector<1x1x8x8xbf16>
    %80 = vector.shape_cast %79 : vector<1x1x8x8xbf16> to vector<8x8xbf16>
    %c0_70 = arith.constant 0 : index
    %c3_71 = arith.constant 3 : index
    %c0_72 = arith.constant 0 : index
    %c0_73 = arith.constant 0 : index
    %81 = vector.load %arg5[%c0_70, %c3_71, %c0_72, %c0_73] : memref<1x4x8x8xbf16, #tpu.memory_space<vmem>>, vector<1x1x8x8xbf16>
    %82 = vector.shape_cast %81 : vector<1x1x8x8xbf16> to vector<8x8xbf16>
    %cst_74 = arith.constant dense<0.000000e+00> : vector<8x8xf32>
    %83 = tpu.matmul %78, %80, %cst_74 {dimension_numbers = #tpu.dot_dimension_numbers<[1], [1], [0], [0], [0, 0, 1, 0], [], []>} : vector<8x8xbf16>, vector<8x8xbf16>, vector<8x8xf32> -> vector<8x8xf32>
    %cst_75 = arith.constant dense<0xFF800000> : vector<8xf32>
    %84 = vector.multi_reduction <maximumf>, %83, %cst_75 [1] : vector<8x8xf32> to vector<8xf32>
    %85 = vector.shape_cast %84 : vector<8xf32> to vector<8x1xf32>
    %86 = vector.broadcast %85 : vector<8x1xf32> to vector<8x8xf32>
    %87 = arith.subf %83, %86 : vector<8x8xf32>
    %88 = math.exp %87 : vector<8x8xf32>
    %cst_76 = arith.constant dense<0.000000e+00> : vector<8xf32>
    %89 = vector.multi_reduction <add>, %88, %cst_76 [1] : vector<8x8xf32> to vector<8xf32>
    %90 = vector.shape_cast %89 : vector<8xf32> to vector<8x1xf32>
    %91 = tpu.reciprocal %90 {approx = true} : vector<8x1xf32> -> vector<8x1xf32>
    %92 = vector.broadcast %91 : vector<8x1xf32> to vector<8x8xf32>
    %93 = arith.mulf %88, %92 : vector<8x8xf32>
    %94 = arith.truncf %93 : vector<8x8xf32> to vector<8x8xbf16>
    %c0_77 = arith.constant 0 : index
    %c3_78 = arith.constant 3 : index
    %c0_79 = arith.constant 0 : index
    %c0_80 = arith.constant 0 : index
    %95 = vector.load %arg15[%c0_77, %c3_78, %c0_79, %c0_80] : memref<1x4x8x8xbf16, #tpu.memory_space<vmem>>, vector<1x1x8x8xbf16>
    %96 = vector.shape_cast %95 : vector<1x1x8x8xbf16> to vector<8x8xbf16>
    %97 = vector.shape_cast %94 : vector<8x8xbf16> to vector<1x1x8x8xbf16>
    tpu.vector_store %arg15[%c0_77, %c3_78, %c0_79, %c0_80], %97 {strides = array<i32>} : memref<1x4x8x8xbf16, #tpu.memory_space<vmem>>, vector<1x1x8x8xbf16>,
    %98 = arith.truncf %93 : vector<8x8xf32> to vector<8x8xbf16>
    %cst_81 = arith.constant dense<0.000000e+00> : vector<8x8xf32>
    %99 = tpu.matmul %98, %82, %cst_81 {dimension_numbers = #tpu.dot_dimension_numbers<[1], [0], [0], [1], [0, 0, 1, 1], [], []>} : vector<8x8xbf16>, vector<8x8xbf16>, vector<8x8xf32> -> vector<8x8xf32>
    %100 = arith.truncf %99 : vector<8x8xf32> to vector<8x8xbf16>
    %c0_82 = arith.constant 0 : index
    %c24 = arith.constant 24 : index
    %101 = vector.load %arg16[%c0_82, %c24] : memref<8x32xbf16, #tpu.memory_space<vmem>>, vector<8x8xbf16>
    tpu.vector_store %arg16[%c0_82, %c24], %100 {strides = array<i32>} : memref<8x32xbf16, #tpu.memory_space<vmem>>, vector<8x8xbf16>,
    %c0_83 = arith.constant 0 : index
    %c0_84 = arith.constant 0 : index
    %102 = vector.load %arg16[%c0_83, %c0_84] : memref<8x32xbf16, #tpu.memory_space<vmem>>, vector<8x32xbf16>
    %c0_85 = arith.constant 0 : index
    %c0_86 = arith.constant 0 : index
    %103 = vector.load %arg6[%c0_85, %c0_86] : memref<32x32xbf16, #tpu.memory_space<vmem>>, vector<32x32xbf16>
    %cst_87 = arith.constant dense<0.000000e+00> : vector<8x32xf32>
    %104 = tpu.matmul %102, %103, %cst_87 {dimension_numbers = #tpu.dot_dimension_numbers<[1], [0], [0], [1], [0, 0, 1, 1], [], []>} : vector<8x32xbf16>, vector<32x32xbf16>, vector<8x32xf32> -> vector<8x32xf32>
    %c0_88 = arith.constant 0 : index
    %c0_89 = arith.constant 0 : index
    %105 = vector.load %arg7[%c0_88, %c0_89] : memref<1x32xf32, #tpu.memory_space<vmem>>, vector<1x32xf32>
    %106 = vector.broadcast %105 : vector<1x32xf32> to vector<8x32xf32>
    %107 = arith.addf %104, %106 : vector<8x32xf32>
    %108 = arith.addf %1, %107 : vector<8x32xf32>
    %c0_90 = arith.constant 0 : index
    %c0_91 = arith.constant 0 : index
    %109 = vector.load %arg8[%c0_90, %c0_91] : memref<1x32xf32, #tpu.memory_space<vmem>>, vector<1x32xf32>
    %c0_92 = arith.constant 0 : index
    %c0_93 = arith.constant 0 : index
    %110 = vector.load %arg9[%c0_92, %c0_93] : memref<1x32xf32, #tpu.memory_space<vmem>>, vector<1x32xf32>
    %cst_94 = arith.constant dense<0.000000e+00> : vector<8xf32>
    %111 = vector.multi_reduction <add>, %108, %cst_94 [1] : vector<8x32xf32> to vector<8xf32>
    %112 = vector.shape_cast %111 : vector<8xf32> to vector<8x1xf32>
    %cst_95 = arith.constant 3.200000e+01 : f32
    %113 = vector.broadcast %cst_95 : f32 to vector<8x1xf32>
    %114 = arith.divf %112, %113 : vector<8x1xf32>
    %115 = vector.broadcast %114 : vector<8x1xf32> to vector<8x32xf32>
    %116 = arith.subf %108, %115 : vector<8x32xf32>
    %117 = arith.mulf %116, %116 : vector<8x32xf32>
    %cst_96 = arith.constant dense<0.000000e+00> : vector<8xf32>
    %118 = vector.multi_reduction <add>, %117, %cst_96 [1] : vector<8x32xf32> to vector<8xf32>
    %119 = vector.shape_cast %118 : vector<8xf32> to vector<8x1xf32>
    %cst_97 = arith.constant 3.200000e+01 : f32
    %120 = vector.broadcast %cst_97 : f32 to vector<8x1xf32>
    %121 = arith.divf %119, %120 : vector<8x1xf32>
    %cst_98 = arith.constant 9.99999974E-6 : f32
    %122 = vector.broadcast %cst_98 : f32 to vector<8x1xf32>
    %123 = arith.addf %121, %122 : vector<8x1xf32>
    %124 = math.rsqrt %123 : vector<8x1xf32>
    %125 = vector.broadcast %124 : vector<8x1xf32> to vector<8x32xf32>
    %126 = arith.mulf %116, %125 : vector<8x32xf32>
    %127 = vector.broadcast %109 : vector<1x32xf32> to vector<8x32xf32>
    %128 = arith.mulf %126, %127 : vector<8x32xf32>
    %129 = vector.broadcast %110 : vector<1x32xf32> to vector<8x32xf32>
    %130 = arith.addf %128, %129 : vector<8x32xf32>
    %131 = arith.truncf %130 : vector<8x32xf32> to vector<8x32xbf16>
    %c0_99 = arith.constant 0 : index
    %c0_100 = arith.constant 0 : index
    %132 = vector.load %arg10[%c0_99, %c0_100] : memref<32x128xbf16, #tpu.memory_space<vmem>>, vector<32x128xbf16>
    %cst_101 = arith.constant dense<0.000000e+00> : vector<8x128xf32>
    %133 = tpu.matmul %131, %132, %cst_101 {dimension_numbers = #tpu.dot_dimension_numbers<[1], [0], [0], [1], [0, 0, 1, 1], [], []>} : vector<8x32xbf16>, vector<32x128xbf16>, vector<8x128xf32> -> vector<8x128xf32>
    %c0_102 = arith.constant 0 : index
    %c0_103 = arith.constant 0 : index
    %134 = vector.load %arg11[%c0_102, %c0_103] : memref<1x128xf32, #tpu.memory_space<vmem>>, vector<1x128xf32>
    %135 = vector.broadcast %134 : vector<1x128xf32> to vector<8x128xf32>
    %136 = arith.addf %133, %135 : vector<8x128xf32>
    %cst_104 = arith.constant 5.000000e-01 : f32
    %137 = vector.broadcast %cst_104 : f32 to vector<8x128xf32>
    %138 = arith.mulf %137, %136 : vector<8x128xf32>
    %cst_105 = arith.constant 0.707106769 : f32
    %139 = vector.broadcast %cst_105 : f32 to vector<8x128xf32>
    %140 = arith.mulf %136, %139 : vector<8x128xf32>
    %141 = math.erf %140 : vector<8x128xf32>
    %cst_106 = arith.constant 1.000000e+00 : f32
    %142 = vector.broadcast %cst_106 : f32 to vector<8x128xf32>
    %143 = arith.addf %142, %141 : vector<8x128xf32>
    %144 = arith.mulf %138, %143 : vector<8x128xf32>
    %145 = arith.truncf %144 : vector<8x128xf32> to vector<8x128xbf16>
    %c0_107 = arith.constant 0 : index
    %c0_108 = arith.constant 0 : index
    %146 = vector.load %arg12[%c0_107, %c0_108] : memref<128x32xbf16, #tpu.memory_space<vmem>>, vector<128x32xbf16>
    %cst_109 = arith.constant dense<0.000000e+00> : vector<8x32xf32>
    %147 = tpu.matmul %145, %146, %cst_109 {dimension_numbers = #tpu.dot_dimension_numbers<[1], [0], [0], [1], [0, 0, 1, 1], [], []>} : vector<8x128xbf16>, vector<128x32xbf16>, vector<8x32xf32> -> vector<8x32xf32>
    %c0_110 = arith.constant 0 : index
    %c0_111 = arith.constant 0 : index
    %148 = vector.load %arg13[%c0_110, %c0_111] : memref<1x32xf32, #tpu.memory_space<vmem>>, vector<1x32xf32>
    %149 = vector.broadcast %148 : vector<1x32xf32> to vector<8x32xf32>
    %150 = arith.addf %147, %149 : vector<8x32xf32>
    %151 = arith.addf %108, %150 : vector<8x32xf32>
    %c0_112 = arith.constant 0 : index
    %c0_113 = arith.constant 0 : index
    %c0_114 = arith.constant 0 : index
    %152 = vector.load %arg14[%c0_112, %c0_113, %c0_114] : memref<1x8x32xf32, #tpu.memory_space<vmem>>, vector<1x8x32xf32>
    %153 = vector.shape_cast %152 : vector<1x8x32xf32> to vector<8x32xf32>
    %154 = vector.shape_cast %151 : vector<8x32xf32> to vector<1x8x32xf32>
    tpu.vector_store %arg14[%c0_112, %c0_113, %c0_114], %154 {strides = array<i32>} : memref<1x8x32xf32, #tpu.memory_space<vmem>>, vector<1x8x32xf32>,
    return
  }
  func.func @transform_0(%arg0: i32, %arg1: i32) -> (i32, i32, i32) {
    %c0_i32 = arith.constant 0 : i32
    %c0_i32_0 = arith.constant 0 : i32
    return %arg0, %arg1, %c0_i32 : i32, i32, i32
  }
  func.func @transform_1(%arg0: i32, %arg1: i32) -> (i32, i32, i32, i32) {
    %c0_i32 = arith.constant 0 : i32
    %c0_i32_0 = arith.constant 0 : i32
    %c0_i32_1 = arith.constant 0 : i32
    return %arg0, %c0_i32, %arg1, %c0_i32_0 : i32, i32, i32, i32
  }
  func.func @transform_2(%arg0: i32, %arg1: i32) -> (i32, i32, i32, i32) {
    %c0_i32 = arith.constant 0 : i32
    %c0_i32_0 = arith.constant 0 : i32
    %c0_i32_1 = arith.constant 0 : i32
    %c0_i32_2 = arith.constant 0 : i32
    return %arg0, %c0_i32, %c0_i32_0, %c0_i32_1 : i32, i32, i32, i32
  }
  func.func @transform_3(%arg0: i32, %arg1: i32) -> (i32, i32, i32, i32) {
    %c0_i32 = arith.constant 0 : i32
    %c0_i32_0 = arith.constant 0 : i32
    %c0_i32_1 = arith.constant 0 : i32
    %c0_i32_2 = arith.constant 0 : i32
    return %arg0, %c0_i32, %c0_i32_0, %c0_i32_1 : i32, i32, i32, i32
  }
  func.func @transform_4(%arg0: i32, %arg1: i32) -> (i32, i32) {
    %c0_i32 = arith.constant 0 : i32
    %c0_i32_0 = arith.constant 0 : i32
    %c0_i32_1 = arith.constant 0 : i32
    return %c0_i32, %c0_i32_0 : i32, i32
  }
  func.func @transform_5(%arg0: i32, %arg1: i32) -> (i32, i32) {
    %c0_i32 = arith.constant 0 : i32
    %c0_i32_0 = arith.constant 0 : i32
    %c0_i32_1 = arith.constant 0 : i32
    return %c0_i32, %c0_i32_0 : i32, i32
  }
  func.func @transform_6(%arg0: i32, %arg1: i32) -> (i32, i32) {
    %c0_i32 = arith.constant 0 : i32
    %c0_i32_0 = arith.constant 0 : i32
    %c0_i32_1 = arith.constant 0 : i32
    return %c0_i32, %c0_i32_0 : i32, i32
  }
  func.func @transform_7(%arg0: i32, %arg1: i32) -> (i32, i32) {
    %c0_i32 = arith.constant 0 : i32
    %c0_i32_0 = arith.constant 0 : i32
    %c0_i32_1 = arith.constant 0 : i32
    return %c0_i32, %c0_i32_0 : i32, i32
  }
  func.func @transform_8(%arg0: i32, %arg1: i32) -> (i32, i32) {
    %c0_i32 = arith.constant 0 : i32
    %c0_i32_0 = arith.constant 0 : i32
    %c0_i32_1 = arith.constant 0 : i32
    return %c0_i32, %c0_i32_0 : i32, i32
  }
  func.func @transform_9(%arg0: i32, %arg1: i32) -> (i32, i32) {
    %c0_i32 = arith.constant 0 : i32
    %c0_i32_0 = arith.constant 0 : i32
    %c0_i32_1 = arith.constant 0 : i32
    return %c0_i32, %c0_i32_0 : i32, i32
  }
  func.func @transform_10(%arg0: i32, %arg1: i32) -> (i32, i32) {
    %c0_i32 = arith.constant 0 : i32
    %c0_i32_0 = arith.constant 0 : i32
    %c0_i32_1 = arith.constant 0 : i32
    return %c0_i32, %c0_i32_0 : i32, i32
  }
  func.func @transform_11(%arg0: i32, %arg1: i32) -> (i32, i32) {
    %c0_i32 = arith.constant 0 : i32
    %c0_i32_0 = arith.constant 0 : i32
    %c0_i32_1 = arith.constant 0 : i32
    return %c0_i32, %c0_i32_0 : i32, i32
  }
  func.func @transform_12(%arg0: i32, %arg1: i32) -> (i32, i32, i32) {
    %c0_i32 = arith.constant 0 : i32
    %c0_i32_0 = arith.constant 0 : i32
    return %arg0, %arg1, %c0_i32 : i32, i32, i32
  }
  func.func @transform_13(%arg0: i32, %arg1: i32) -> (i32, i32, i32, i32) {
    %c0_i32 = arith.constant 0 : i32
    %c0_i32_0 = arith.constant 0 : i32
    %c0_i32_1 = arith.constant 0 : i32
    return %arg0, %c0_i32, %arg1, %c0_i32_0 : i32, i32, i32, i32
  }
}

</mosaic_0001>

<bundles_post_ra>
// kernel: tpu_custom_call.1
= control target key start
LH: loop header
LB: loop body
LE: loop exit
PB: predicated region body
PF: predicated region fallthrough
CT: control target
= control target key end

     0   :  { %6 = vsyncpa [#allocation3], 0  ;;  %s480_s0 = inlined_call_operand.hbm [shape: f32[16,128], index: 0, kind: input, shape index: {}]   ;;  %s481_s1 = inlined_call_operand.hbm [shape: f32[16,128], index: 1, kind: output, shape index: {}]  }
   0x1   :  { %7 = vsyncpa [#allocation4], 0 }
   0x2   :  { %9 = vsyncpa [#allocation4 + $0x1], 0  ;;  %s360_s6 = smov 0   ;;  %s362_s7 = smov 0  }
   0x3   :  { %s364_s8 = smov 0   ;;  %s366_s9 = smov 0  }
   0x4 LB: > { %s381_s10 = sadd.s32 4294967295, %s347_s9   ;;  %s196_s11 = sadd.s32 4294967294, %s347_s9   ;;  %s347_s9 = sphi %s366_s9, %s490_s9   ;;  %s343_s8 = sphi %s364_s8, %s489_s8   ;;  %s339_s7 = sphi %s362_s7, %s488_s7   ;;  %s335_s6 = sphi %s360_s6, %s487_s6  }
   0x5   : > { %s385_s12 = sadd.s32 1, %s347_s9   ;;  %s22_s13 = sadd.s32 1, %s343_s8 }
   0x6   : > { %s19_s14 = ssub.s32 %s347_s9, %s385_s12  ;;  %p35_p0 = scmp.ne.s32.totalorder %s339_s7, %s335_s6 }
   0x7   : > { %p20_p1 = scmp.eq.s32.totalorder %s19_s14, 0  ;;  %p36_p2 = scmp.eq.s32.totalorder %s381_s10, 0 }
   0x8   : > { %p58_p3 = scmp.ne.s32.totalorder %s343_s8, %s339_s7  ;;  %p59_p4 = scmp.eq.s32.totalorder %s381_s10, 1 }
   0x9   : > { %s397_s15 = scalar_select %p20_p1, %s343_s8, %s22_s13  }
   0xa   : > { %p399_p5 = por %p36_p2, %p35_p0  ;;  %p403_p6 = por %p59_p4, %p58_p3 }
   0xb   : > { %p65_p7 = scmp.eq.s32.totalorder %s196_s11, 1  ;;  %p197_p8 = scmp.ge.s32.totalorder %s347_s9, 1 }
   0xc   : > { %p72_p9 = scmp.lt.s32.totalorder %s347_s9, 3  ;;  %s198_s18 = sshll.u32 %s381_s10, 3 }
   0xd   : > { %p410_p10 = por %p65_p7, %p35_p0  ;;  %s84_s22 = scalar_lea.hbm %s480_s0, %s198_s18 }
   0xe   : > { %p419_p11 = pnand %p197_p8, %p72_p9  ;;  %s86_s24 = sshll.u32 %s84_s22, 4  ;;  %s87_s24 = int_to_ptr.hbm [resolvable:$true] %s86_s24 }
   0xf   : > { %s349_s25 = smov [#allocation2]   ;;  %s251_s28 = sshra.s32 %s87_s24, 4  ;;  %s252_s28 = int_to_ptr.hbm [resolvable:$true] %s251_s28 }
  0x10   : > { %p209_p12 = pneg %p419_p11  ;;  %s88_s26 = sshll.u32 %s349_s25, 4  ;;  %s89_s26 = int_to_ptr.vmem [resolvable:$true] %s88_s26 }
  0x11   : > { %s253_s29 = scalar_lea.hbm %s252_s28, 8  ;;  %s258_s3 = scalar_lea.hbm %s480_s0, 16 }
  0x12   : > { %p427_p13 = pnand %p209_p12, %p399_p5  ;;  %p254_p0 = scmp.ne.s32.totalorder %s252_s28, %s253_s29 }
  0x13   : > { %p259_p4 = scmp.lt.s32.totalorder %s252_s28, %s480_s0  ;;  %p260_p7 = scmp.lt.s32.totalorder %s258_s3, %s253_s29 }
  0x14   : > { %p255_p1 = pneg %p427_p13 }
  0x15   : > { %p261_p8 = por %p260_p7, %p259_p4 }
  0x16   : > { %p256_p2 = pnand %p255_p1, %p254_p0 }
  0x18   : > { %p257_p3 = pneg %p256_p2 }
  0x1a   : > { %p262_p9 = pnand %p261_p8, %p257_p3 }
  0x1c   : > { %265 = shalt.err (!%p262_p9)
}
  0x1d   : > { %212 = dma.hbm_to_vmem [thread:$0]  (!%p427_p13), %s87_s24, 128, %s89_s26, [#allocation3]  }
  0x1e   : > { %101 = sbr.rel (%p419_p11) target bundleno = 51 (0x33), region = 24 }
  0x23   : > { %326 = dma.done.wait (%p399_p5), [#allocation3], 128  }
  0x24   : > { %328 = vsyncadd (%p399_p5), [#allocation3], 4294967168  ;;  %s114_s11 = sand.u32 1, %s339_s7   ;;  %s130_s20 = scalar_lea.hbm %s481_s1, %s198_s18  ;;  %v117_v0 = vld [vmem:[#allocation2] sm:$0xff] }
  0x25   : > { %s200_s21 = sshll.u32 %s114_s11, 3  ;;  %s134_s23 = sshll.u32 %s130_s20, 4  ;;  %s135_s23 = int_to_ptr.hbm [resolvable:$true] %s134_s23 }
  0x26   : > { %s116_s22 = scalar_lea.vmem [#allocation5], %s200_s21  ;;  %s120_s25 = scalar_lea.sflag [#allocation4], %s114_s11 }
  0x27   : > { %s132_s24 = sshll.u32 %s116_s22, 4  ;;  %118 = vst [vmem:[%s116_s22] sm:$0xff] %v117_v0  ;;  %s295_s16 = sshra.s32 %s135_s23, 4  ;;  %s133_s24 = int_to_ptr.vmem [resolvable:$true] %s132_s24  ;;  %s296_s16 = int_to_ptr.hbm [resolvable:$true] %s295_s16 }
  0x28   : > { %s297_s26 = scalar_lea.hbm %s296_s16, 8  ;;  %s301_s18 = scalar_lea.hbm %s481_s1, 16 }
  0x29   : > { %p298_p5 = scmp.ne.s32.totalorder %s296_s16, %s297_s26  ;;  %p302_p13 = scmp.lt.s32.totalorder %s296_s16, %s481_s1 }
  0x2a   : > { %p303_p0 = scmp.lt.s32.totalorder %s301_s18, %s297_s26 }
  0x2b   : > { %p299_p11 = pnand %p298_p5, %p403_p6 }
  0x2c   : > { %p304_p1 = por %p303_p0, %p302_p13 }
  0x2d   : > { %p300_p12 = pneg %p299_p11 }
  0x2f   : > { %p305_p2 = pnand %p304_p1, %p300_p12 }
  0x31   : > { %308 = shalt.err (!%p305_p2)
}
  0x32   : > { %207 = dma.vmem_to_hbm [thread:$0]  (%p403_p6), %s133_s24, 128, %s135_s23, %s120_s25  }
  0x33 PF: > { %p217_p3 = scmp.ge.s32.totalorder %s347_s9, 2  ;;  %s146_s30 = sand.u32 1, %s335_s6  }
  0x34   : > { %s147_s2 = scalar_lea.sflag [#allocation4], %s146_s30 }
  0x35   : > { %p214_p4 = pnand %p217_p3, %p410_p10 }
  0x37   : > { %p215_p7 = pneg %p214_p4 }
  0x39   : > { %330 = dma.done.wait (%p215_p7), %s147_s2, 128  }
  0x3a   : > { %332 = vsyncadd (%p215_p7), %s147_s2, 4294967168  ;;  %p12_p8 = scmp.ge.s32.totalorder %s385_s12, 4   ;;  %s487_s6 = smov %s339_s7 }
  0x3b   : > { %s488_s7 = smov %s343_s8  ;;  %s489_s8 = smov %s397_s15 }
  0x3c   : > { %s490_s9 = smov %s385_s12  ;;  %14 = sbr.rel (!%p12_p8) target bundleno = 4 (0x4), region = 62 }
  0x41   :  { %153 = vsyncpa [#allocation3], 1 }
  0x42   :  { %155 = vsyncpa [#allocation3 + $0x1], 1 }
  0x43   :  { %156 = vsyncpa [#allocation4], 1 }
  0x44   :  { %158 = vsyncpa [#allocation4 + $0x1], 1 }

// kernel: tpu_custom_call.1
= control target key start
LH: loop header
LB: loop body
LE: loop exit
PB: predicated region body
PF: predicated region fallthrough
CT: control target
= control target key end

     0   :  { %s2137_s0 = inlined_call_operand.vmem [shape: f32[2,8,32], index: 0, kind: input, shape index: {}]   ;;  %s2138_s1 = inlined_call_operand.vmem [shape: bf16[2,4,8,8], index: 1, kind: input, shape index: {}]   ;;  %s2139_s2 = inlined_call_operand.vmem [shape: bf16[2,4,8,8], index: 2, kind: input, shape index: {}]   ;;  %s2140_s3 = inlined_call_operand.hbm [shape: bf16[2,4,8,8], index: 3, kind: input, shape index: {}]   ;;  %s2141_s4 = inlined_call_operand.hbm [shape: bf16[32,32], index: 4, kind: input, shape index: {}]   ;;  %s2142_s5 = inlined_call_operand.vmem [shape: f32[1,32], index: 5, kind: input, shape index: {}]   ;;  %s2143_s6 = inlined_call_operand.vmem [shape: f32[1,32], index: 6, kind: input, shape index: {}]   ;;  %s2144_s7 = inlined_call_operand.vmem [shape: f32[1,32], index: 7, kind: input, shape index: {}]   ;;  %s2145_s8 = inlined_call_operand.hbm [shape: bf16[32,128], index: 8, kind: input, shape index: {}]   ;;  %s2146_s9 = inlined_call_operand.vmem [shape: f32[1,128], index: 9, kind: input, shape index: {}]   ;;  %s2147_s10 = inlined_call_operand.vmem [shape: bf16[128,32], index: 10, kind: input, shape index: {}]   ;;  %s2148_s11 = inlined_call_operand.vmem [shape: f32[1,32], index: 11, kind: input, shape index: {}]   ;;  %s2149_s12 = inlined_call_operand.hbm [shape: f32[2,8,32], index: 12, kind: output, shape index: {0}]   ;;  %s2150_s13 = inlined_call_operand.hbm [shape: bf16[2,4,8,8], index: 13, kind: output, shape index: {1}]  }
   0x1   :  { %2161 = sst [smem:[#allocation20_spill]] %s2137_s0 }
   0x2   :  { %2162 = sst [smem:[#allocation21_spill]] %s2138_s1 }
   0x3   :  { %2163 = sst [smem:[#allocation22_spill]] %s2139_s2 }
   0x4   :  { %2164 = sst [smem:[#allocation23_spill]] %s2141_s4 }
   0x5   :  { %2165 = sst [smem:[#allocation24_spill]] %s2145_s8 }
   0x6   :  { %2166 = sst [smem:[#allocation25_spill]] %s2146_s9 }
   0x7   :  { %2167 = sst [smem:[#allocation26_spill]] %s2148_s11 }
   0x8   :  { %2168 = sst [smem:[#allocation27_spill]] %s2149_s12 }
   0x9   :  { %2169 = sst [smem:[#allocation28_spill]] %s2150_s13 }
   0xa   :  { %19 = vsyncpa [#allocation4], 0 }
   0xb   :  { %21 = vsyncpa [#allocation4 + $0x1], 0 }
   0xc   :  { %22 = vsyncpa [#allocation7], 0 }
   0xd   :  { %23 = vsyncpa [#allocation5], 0 }
   0xe   :  { %25 = vsyncpa [#allocation5 + $0x1], 0 }
   0xf   :  { %26 = vsyncpa [#allocation11], 0 }
  0x10   :  { %28 = vsyncpa [#allocation11 + $0x1], 0  ;;  %s1844_s25 = smov 0   ;;  %s1846_s26 = smov 0  }
  0x11   :  { %s1848_s27 = smov 0   ;;  %s1850_s28 = smov 0  }
  0x12   :  { %s1852_s29 = smov 0   ;;  %s1854_s30 = smov 0  }
  0x13 LB: > { %2170 = sst [smem:[#allocation16_spill]] %s1742_s25  ;;  %s2151_s14 = sadd.s32 4294967295, %s1762_s30   ;;  %s1762_s30 = sphi %s1854_s30, %s34_s30   ;;  %s1758_s29 = sphi %s1852_s29, %s2200_s29   ;;  %s1754_s28 = sphi %s1850_s28, %s2199_s28   ;;  %s1750_s27 = sphi %s1848_s27, %s2198_s27   ;;  %s1746_s26 = sphi %s1846_s26, %s2197_s26   ;;  %s1742_s25 = sphi %s1844_s25, %s2196_s25  }
  0x14   : > { %s1318_s15 = sadd.s32 4294967294, %s1762_s30   ;;  %p148_p0 = scmp.ne.s32.totalorder %s1746_s26, %s1742_s25 }
  0x15   : > { %p1880_p1 = scmp.eq.s32.totalorder %s2151_s14, 0  ;;  %p348_p2 = scmp.eq.s32.totalorder %s1318_s15, 1 }
  0x16   : > { %p1319_p4 = scmp.ge.s32.totalorder %s1762_s30, 1  ;;  %p383_p6 = scmp.lt.s32.totalorder %s1762_s30, 3 }
  0x17   : > { %p1886_p3 = por %p1880_p1, %p148_p0  ;;  %p1891_p5 = por %p348_p2, %p148_p0 }
  0x18   : > { %s2175_s4 = sld [smem:[#allocation23_spill]]  ;;  %p1899_p7 = pnand %p1319_p4, %p383_p6 }
  0x19   : > { %s2173_s18 = scalar_select %p1891_p5, 1, 0 }
  0x1a   : > { %p1445_p8 = pneg %p1899_p7  ;;  %s1764_s23 = smov [#allocation6]  }
  0x1b   : > { %2174 = sst [smem:[#allocation17_spill]] %s2173_s18  ;;  %s396_s24 = sshll.u32 %s1764_s23, 4  ;;  %s397_s24 = int_to_ptr.vmem [resolvable:$true] %s396_s24 }
  0x1c   : > { %p1446_p9 = pnand %p1445_p8, %p1880_p1  ;;  %p1322_p10 = scmp.ge.s32.totalorder %s1762_s30, 2 }
  0x1d   : > { %s2177_s8 = sld [smem:[#allocation24_spill]]  ;;  %s2153_s14 = smov 64  }
  0x1e   : > { %s394_s21 = sshll.u32 %s2175_s4, 4  ;;  %s2154_s4 = smov 4   ;;  %s395_s21 = int_to_ptr.hbm [resolvable:$true] %s394_s21 }
  0x1f   : > { %1448 = dma.hbm_to_vmem [thread:$0]  (!%p1446_p9), %s395_s21, 256, %s397_s24, [#allocation7], %s2153_s14, %s2153_s14, %s2154_s4  }
  0x20   : > { %s1767_s23 = smov [#allocation8]   ;;  %s2178_s15 = sadd.s32 4294967295, %s1762_s30  }
  0x21   : > { %s419_s18 = sshll.u32 %s1767_s23, 4  ;;  %p342_p11 = scmp.eq.s32.totalorder %s2178_s15, 1  ;;  %s420_s18 = int_to_ptr.vmem [resolvable:$true] %s419_s18 }
  0x22   : > { %s46_s19 = sadd.s32 1, %s1758_s29  ;;  %p142_p13 = scmp.ne.s32.totalorder %s1750_s27, %s1746_s26 }
  0x23   : > { %s417_s20 = sshll.u32 %s2177_s8, 4  ;;  %p48_p12 = scmp.ge.s32.totalorder %s46_s19, 2  ;;  %s418_s20 = int_to_ptr.hbm [resolvable:$true] %s417_s20 }
  0x24   : > { %1451 = dma.hbm_to_vmem [thread:$0]  (!%p1446_p9), %s418_s20, 256, %s420_s18, [#allocation7], %s2153_s14, %s2153_s14, %s2154_s4  }
  0x25   : > { %s135_s8 = sadd.s32 1, %s1750_s27  ;;  %p143_p0 = scmp.eq.s32.totalorder %s1762_s30, 0 }
  0x26   : > { %s2202_s19 = smov (%p48_p12, %s46_s19), 0  ;;  %p1926_p2 = por %p342_p11, %p142_p13 }
  0x27   : > { %2179 = sst [smem:[#allocation18_spill]] %s2202_s19  ;;  %p1465_p4 = scmp.lt.s32.totalorder %s1762_s30, 2 }
  0x28   : > { %s2180_s21 = scalar_select %p1926_p2, 1, 0 }
  0x29   : > { %s132_s24 = ssub.s32 %s1758_s29, %s2202_s19  ;;  %s471_s23 = sand.u32 1, %s1750_s27  }
  0x2a   : > { %2181 = sst [smem:[#allocation19_spill]] %s2180_s21  ;;  %p133_p6 = scmp.eq.s32.totalorder %s132_s24, 0 }
  0x2b   : > { %p144_p8 = por %p143_p0, %p142_p13  ;;  %s1323_s18 = sshll.u32 %s471_s23, 4 }
  0x2c   : > { %s1415_s20 = sshll.u32 %s1758_s29, 4  ;;  %s475_s11 = scalar_lea.vmem [#allocation3], %s1323_s18 }
  0x2d   : > { %s1936_s15 = scalar_select %p133_p6, %s1750_s27, %s135_s8  }
  0x2e   : > { %s480_s25 = scalar_lea.hbm %s2140_s3, %s1415_s20  ;;  %s483_s13 = sshll.u32 %s475_s11, 4  ;;  %s484_s13 = int_to_ptr.vmem [resolvable:$true] %s483_s13 }
  0x2f   : > { %s481_s12 = sshll.u32 %s480_s25, 4  ;;  %p1453_p9 = pnand %p1465_p4, %p144_p8  ;;  %s482_s12 = int_to_ptr.hbm [resolvable:$true] %s481_s12 }
  0x30   : > { %s472_s21 = scalar_lea.sflag [#allocation4], %s471_s23  ;;  %s2182_s19 = smov 4  }
  0x31   : > { %s2183_s9 = smov 64   ;;  %495 = sbr.rel (%p1899_p7) target bundleno = 1838 (0x72e), region = 68 }
  0x32   : > { %1455 = dma.hbm_to_vmem [thread:$0]  (!%p1453_p9), %s482_s12, 256, %s484_s13, %s472_s21, %s2183_s9, %s2183_s9, %s2182_s19  }
  0x33   : > { %s1949_s8 = sand.u32 (!%p1899_p7), 1, %s1746_s26  }
  0x34   : > { %s1327_s4 = sshll.u32 (!%p1899_p7), %s1949_s8, 4  ;;  %s498_s11 = scalar_lea.sflag (!%p1899_p7), [#allocation4], %s1949_s8 }
  0x35   : > { %s1955_s25 = scalar_lea.vmem (!%p1899_p7), [#allocation3], %s1327_s4 }
  0x36   : > { %1725 = dma.done.wait (%p1886_p3), %s498_s11, 256  }
  0x37   : > { %1727 = vsyncadd (%p1886_p3), %s498_s11, 4294967040 }
  0x38   : > { %1729 = dma.done.wait (%p1880_p1), [#allocation7], 512  }
  0x39   : > { %1731 = vsyncadd (%p1880_p1), [#allocation7], 4294966784  ;;  %p580_p7 = scmp.lt.s32.totalorder %s1754_s28, 1  ;;  %s2184_s2 = sld [smem:[#allocation22_spill]]  ;;  %vm605_vm0 = vcmask 64512   ;;  %vm642_vm1 = vcmask 1043456  }
  0x3a   : > { %s2185_s1 = sld [smem:[#allocation21_spill]]  ;;  %v604_v20 = vld [vmem:[%s1955_s25] sm:$0xf]  ;;  %vm637_vm2 = vcmask 60416   ;;  %s2004_s21 = scalar_lea.vmem [#allocation10], %s1327_s4  ;;  %vm724_vm3 = vcmask 126016  }
  0x3b   : > { %s1967_s9 = scalar_select %p580_p7, %s1754_s28, 1  ;;  %v644_v21 = vsel %vm642_vm1, %v604_v20, 0  ;;  %v1341_v40 = vld [vmem:[%s1955_s25 + $0x4] sm:$0xf]  ;;  %v1353_v57 = vld [vmem:[%s1955_s25 + $0xc] sm:$0xf] }
  0x3c   : > { %653 = vmatpush.bf16.msra.mxu1 %v644_v21  ;;  %v704_v41 = vsel %vm642_vm1, %v1341_v40, 0  ;;  %s1768_s24 = smov 8   ;;  %v834_v58 = vsel %vm642_vm1, %v1353_v57, 0  ;;  %s1769_s23 = smov 24   ;;  %vm789_vm4 = vcmask 191616   ;;  %vm854_vm5 = vcmask 257216  }
  0x3d   : > { %s1416_s12 = sshll.u32 %s1967_s9, 4  ;;  %713 = vmatpush.bf16.msra.mxu3 %v704_v41  ;;  %s1770_s18 = smov 16   ;;  %vm877_vm6 = vcmask 261120   ;;  %v1421_v41 = vld [vmem:[#allocation8 + $0x8] sm:$0xff] }
  0x3e   : > { %s1332_s20 = sshll.u32 %s1967_s9, 3  ;;  %s2186_s0 = sld [smem:[#allocation20_spill]] }
  0x3f   : > { %s1973_s22 = scalar_lea.vmem %s2184_s2, %s1416_s12  ;;  %s2187_s4 = sld [smem:[#allocation25_spill]] }
  0x40   : > { %v603_v0 = vld [vmem:[%s1973_s22] sm:$0xf]  ;;  %v1340_v1 = vld [vmem:[%s1973_s22 + $0x4] sm:$0xf]  ;;  %s1982_s19 = scalar_lea.vmem %s2185_s1, %s1416_s12  ;;  %v1352_v9 = vld [vmem:[%s1973_s22 + $0xc] sm:$0xf] }
  0x41   : > { %v610_v2 = vsel %vm605_vm0, %v603_v0, 0  ;;  %v671_v3 = vsel %vm605_vm0, %v1340_v1, 0  ;;  %v602_v4 = vld [vmem:[%s1982_s19] sm:$0xf]  ;;  %v1339_v5 = vld [vmem:[%s1982_s19 + $0x4] sm:$0xf] }
  0x42   : > { %619 = vmatpush.bf16.xpose.msra.mxu2 %v610_v2  ;;  %v801_v10 = vsel %vm605_vm0, %v1352_v9, 0  ;;  %v1351_v11 = vld [vmem:[%s1982_s19 + $0xc] sm:$0xf]  ;;  %v1346_v27 = vld [vmem:[%s1973_s22 + $0x8] sm:$0xf]  ;;  %s1133_s9 = sshll.u32 %s2004_s21, 4  ;;  %s1134_s9 = int_to_ptr.vmem [resolvable:$true] %s1133_s9 }
  0x43   : > { %810 = vmatpush.bf16.xpose.msra.mxu0 %v801_v10  ;;  %v736_v28 = vsel %vm605_vm0, %v1346_v27, 0  ;;  %v1345_v36 = vld [vmem:[%s1982_s19 + $0x8] sm:$0xf]  ;;  %s1105_s22 = scalar_lea.sflag [#allocation11], %s1949_s8 }
  0x44   : > { %745 = vmatpush.bf16.xpose.msrb.mxu1 %v736_v28 }
  0x49   : > { %1337 = vmatmul.msk.bf16.vlgmr.msra.gmra.mxu2 %vm605_vm0, %v602_v4  ;;  %v1347_v4 = vld [vmem:[%s1955_s25 + $0x8] sm:$0xf]  ;;  %s586_s25 = scalar_lea.vmem %s2186_s0, %s1332_s20  ;;  %s1430_s20 = sshll.u32 %s1754_s28, 4 }
  0x4a   : > { %680 = vmatpush.bf16.xpose.msrb.mxu2 %v671_v3  ;;  %1354 = vmatmul.msk.bf16.vlgmr.msra.gmra.mxu0 %vm605_vm0, %v1351_v11 }
  0x52   : > { %843 = vmatpush.bf16.msra.mxu2 %v834_v58 }
  0x59   : > { %1342 = vmatmul.msk.bf16.vlgmr.msrb.gmra.mxu2 %vm605_vm0, %v1339_v5  ;;  %v769_v5 = vsel %vm642_vm1, %v1347_v4, 0 }
  0x5a   : > { %778 = vmatpush.bf16.msrb.mxu3 %v769_v5 }
  0xc7   : > { %v812_v25 = vpop.f32.mrf.mxu0 }
  0xc8   : > { %v816_v26 = vsel %vm605_vm0, %v812_v25, -inf }
  0xc9   : > { %817 = vmax.xlane.f32.xlu2 %v816_v26 }
  0xcc   : > { %v621_v6 = vpop.f32.mrf.mxu2 }
  0xcd   : > { %v625_v7 = vsel %vm605_vm0, %v621_v6, -inf }
  0xce   : > { %626 = vmax.xlane.f32.xlu0 %v625_v7 }
  0xcf   : > { %v814_v31 = vpop.f32.mrf.mxu0 }
  0xd4   : > { %v623_v8 = vpop.f32.mrf.mxu2 }
  0xdc   : > { %v682_v12 = vpop.f32.mrf.mxu2 }
  0xdd   : > { %v686_v13 = vsel %vm605_vm0, %v682_v12, -inf }
  0xde   : > { %687 = vmax.xlane.f32.xlu1 %v686_v13 }
  0xe4   : > { %v684_v14 = vpop.f32.mrf.mxu2 }
  0xe5   : > { %v1419_v14 = vld [vmem:[#allocation6 + $0x8] sm:$0xff] }
 0x13c   : > { %v818_v37 = vpop.xlane.xlu2 %817 }
 0x13d   : > { %v819_v46 = vsub.f32 %v812_v25, %v818_v37 }
 0x13f   : > { %v820_v48 = vmul.f32 1.442695, %v819_v46 }
 0x141   : > { %v627_v15 = vpop.xlane.xlu0 %626 }
 0x142   : > { %v628_v16 = vsub.f32 %v621_v6, %v627_v15 }
 0x144   : > { %v629_v17 = vmul.f32 1.442695, %v628_v16 }
 0x146   : > { %1532 = vpow2.f32 %v629_v17 }
 0x14c   : > { %v1533_v18 = vpop.eup %1532 }
 0x14d   : > { %v631_v19 = vsel %vm605_vm0, %v1533_v18, 0.0 }
 0x14e   : > { %632 = vadd.xlane.f32.xlu0 %v631_v19 }
 0x151   : > { %v688_v22 = vpop.xlane.xlu1 %687 }
 0x152   : > { %v689_v23 = vsub.f32 %v682_v12, %v688_v22  ;;  %v1527_v22 = vld [vmem:[%s2142_s5] ss:$0 sm:$0xff] }
 0x154   : > { %v690_v24 = vmul.f32 1.442695, %v689_v23  ;;  %v601_v23 = vld [vmem:[%s586_s25] sm:$0xff]  ;;  %s2189_s25 = sld [smem:[#allocation28_spill]] }
 0x156   : > { %1534 = vpow2.f32 %v690_v24 }
 0x15a   : > { %s2190_s12 = smov %s2189_s25  ;;  %s1132_s13 = scalar_lea.hbm %s2189_s25, %s1430_s20 }
 0x15b   : > { %s1135_s14 = sshll.u32 %s1132_s13, 4  ;;  %s1136_s14 = int_to_ptr.hbm [resolvable:$true] %s1135_s14 }
 0x15c   : > { %v1535_v29 = vpop.eup %1534  ;;  %s1658_s16 = sshra.s32 %s1136_s14, 4  ;;  %s1659_s16 = int_to_ptr.hbm [resolvable:$true] %s1658_s16 }
 0x15d   : > { %v692_v30 = vsel %vm605_vm0, %v1535_v29, 0.0  ;;  %s1660_s17 = scalar_lea.hbm %s1659_s16, 16  ;;  %p1665_p12 = scmp.lt.s32.totalorder %s1659_s16, %s2190_s12 }
 0x15e   : > { %693 = vadd.xlane.f32.xlu2 %v692_v30  ;;  %p1661_p1 = scmp.ne.s32.totalorder %s1659_s16, %s1660_s17 }
 0x160   : > { %p1662_p3 = pnand %p1661_p1, %p1926_p2 }
 0x162   : > { %p1663_p11 = pneg %p1662_p3 }
 0x1c1   : > { %v633_v32 = vpop.xlane.xlu0 %632 }
 0x1c2   : > { %1536 = vrcp.f32 %v633_v32 }
 0x1c8   : > { %v1537_v33 = vpop.eup %1536 }
 0x1c9   : > { %v635_v34 = vmul.f32 %v1537_v33, %v1533_v18  ;;  %v1418_v18 = vld [vmem:[#allocation6] sm:$0xff] }
 0x1cb   : > { %v636_v35 = vpack.c.bf16 %v635_v34, %v635_v34 }
 0x1cd   : > { %1338 = vmatmul.msk.bf16.vlgmr.msra.gmra.mxu1 %vm605_vm0, %v636_v35  ;;  %638 = vst.msk [vmem:[%s2004_s21] sm:$0xf] %vm637_vm2, %v636_v35 }
 0x1ce   : > { %887 = vmatpush.bf16.msra.mxu1 %v1419_v14  ;;  %v1423_v14 = vld [vmem:[%s2147_s10 + $0x8] sm:$0xff] }
 0x1d1   : > { %v694_v38 = vpop.xlane.xlu2 %693 }
 0x1d2   : > { %1538 = vrcp.f32 %v694_v38  ;;  %888 = vmatpush.bf16.msra.mxu1 %v1418_v18  ;;  %v1422_v18 = vld [vmem:[%s2147_s10] sm:$0xff] }
 0x1d3   : > { %1540 = vpow2.f32 %v820_v48 }
 0x1d8   : > { %v1539_v39 = vpop.eup %1538 }
 0x1d9   : > { %v696_v42 = vmul.f32 %v1539_v39, %v1535_v29  ;;  %v1541_v51 = vpop.eup %1540  ;;  %v1771_v29 = vmov 32.0  }
 0x1da   : > { %v822_v52 = vsel %vm605_vm0, %v1541_v51, 0.0 }
 0x1db   : > { %v697_v43 = vpack.c.bf16 %v696_v42, %v696_v42  ;;  %v1420_v42 = vld [vmem:[#allocation8] sm:$0xff] }
 0x1dd   : > { %1348 = vmatmul.msk.bf16.vlgmr.msrb.gmra.mxu1 %vm605_vm0, %v1345_v36  ;;  %1343 = vst.msk [vmem:[%s2004_s21 + $0x4] sm:$0xf] %vm637_vm2, %v697_v43  ;;  %1344 = vmatmul.msk.bf16.vlgmr.msra.gmra.mxu3 %vm605_vm0, %v697_v43 }
 0x1de   : > { %964 = vmatpush.bf16.msra.mxu3 %v1421_v41 }
 0x1e2   : > { %965 = vmatpush.bf16.msra.mxu3 %v1420_v42 }
 0x24a   : > { %v655_v44 = vpop.f32.mrf.mxu1 }
 0x24b   : > { %v659_v45 = vpack.c.bf16 %v655_v44, %v655_v44 }
 0x24d   : > { %660 = vst.msk [vmem:[#allocation2] sm:$0xf] %vm637_vm2, %v659_v45 }
 0x252   : > { %v657_v47 = vpop.f32.mrf.mxu1 }
 0x25a   : > { %v747_v49 = vpop.f32.mrf.mxu1 }
 0x25b   : > { %v751_v50 = vsel %vm605_vm0, %v747_v49, -inf }
 0x25c   : > { %752 = vmax.xlane.f32.xlu1 %v751_v50 }
 0x260   : > { %v715_v54 = vpop.f32.mrf.mxu3 }
 0x261   : > { %v719_v55 = vpack.c.bf16 %v715_v54, %v715_v54 }
 0x262   : > { %v749_v53 = vpop.f32.mrf.mxu1 }
 0x263   : > { %721 = vrot.lane.b32.xlu2 %v719_v55, %s1768_s24  ;;  %v1529_v55 = vld [vmem:[%s2144_s7] ss:$0 sm:$0xff] }
 0x264   : > { %823 = vadd.xlane.f32.xlu1 %v822_v52  ;;  %v1528_v52 = vld [vmem:[%s2143_s6] ss:$0 sm:$0xff] }
 0x268   : > { %v717_v56 = vpop.f32.mrf.mxu3 }
 0x2bd   : > { %v722_v6 = vpop.permute.xlu2 %721 }
 0x2be   : > { %725 = vst.msk [vmem:[#allocation2] sm:$0xf] %vm724_vm3, %v722_v6  ;;  %v1425_v6 = vld [vmem:[%s2147_s10 + $0x18] sm:$0xff] }
 0x2cf   : > { %v753_v59 = vpop.xlane.xlu1 %752 }
 0x2d0   : > { %v754_v60 = vsub.f32 %v747_v49, %v753_v59  ;;  %v1429_v59 = vld [vmem:[%s2147_s10 + $0x38] sm:$0xff] }
 0x2d1   : > { %1084 = vmatpush.bf16.msrb.mxu0 %v1429_v59 }
 0x2d2   : > { %v755_v61 = vmul.f32 1.442695, %v754_v60  ;;  %v1428_v60 = vld [vmem:[%s2147_s10 + $0x30] sm:$0xff] }
 0x2d4   : > { %1542 = vpow2.f32 %v755_v61  ;;  %v1530_v61 = vld [vmem:[%s2187_s4] ss:$0 sm:$0xff] }
 0x2d5   : > { %1085 = vmatpush.bf16.msrb.mxu0 %v1428_v60 }
 0x2d7   : > { %v824_v62 = vpop.xlane.xlu1 %823 }
 0x2d8   : > { %1544 = vrcp.f32 %v824_v62 }
 0x2da   : > { %v1543_v63 = vpop.eup %1542 }
 0x2db   : > { %v757_v0 = vsel %vm605_vm0, %v1543_v63, 0.0 }
 0x2dc   : > { %758 = vadd.xlane.f32.xlu0 %v757_v0 }
 0x2de   : > { %v1545_v1 = vpop.eup %1544 }
 0x2df   : > { %v826_v2 = vmul.f32 %v1545_v1, %v1541_v51 }
 0x2e1   : > { %v827_v3 = vpack.c.bf16 %v826_v2, %v826_v2  ;;  %v1426_v2 = vld [vmem:[%s2147_s10 + $0x20] sm:$0xff] }
 0x2e3   : > { %1355 = vst.msk [vmem:[%s2004_s21 + $0xc] sm:$0xf] %vm637_vm2, %v827_v3  ;;  %1356 = vmatmul.msk.bf16.vlgmr.msra.gmra.mxu2 %vm605_vm0, %v827_v3 }
 0x34f   : > { %v759_v7 = vpop.xlane.xlu0 %758 }
 0x350   : > { %1546 = vrcp.f32 %v759_v7 }
 0x351   : > { %1548 = vrcp.f32 %v1771_v29 }
 0x356   : > { %v1547_v8 = vpop.eup %1546 }
 0x357   : > { %v761_v9 = vmul.f32 %v1547_v8, %v1543_v63  ;;  %v1549_v30 = vpop.eup %1548  ;;  %v1427_v63 = vld [vmem:[%s2147_s10 + $0x28] sm:$0xff] }
 0x358   : > { %v901_v31 = vmul.f32 32.0, %v1549_v30  ;;  %vm905_vm7 = vweird.f32 %v1549_v30  ;;  %1086 = vmatpush.bf16.msrb.mxu0 %v1427_v63 }
 0x359   : > { %v762_v10 = vpack.c.bf16 %v761_v9, %v761_v9 }
 0x35a   : > { %v902_v32 = vsub.f32 1.0, %v901_v31 }
 0x35b   : > { %1349 = vst.msk [vmem:[%s2004_s21 + $0x8] sm:$0xf] %vm637_vm2, %v762_v10  ;;  %1350 = vmatmul.msk.bf16.vlgmr.msrb.gmra.mxu3 %vm605_vm0, %v762_v10 }
 0x35c   : > { %v903_v33 = vmul.f32 %v1549_v30, %v902_v32  ;;  %1087 = vmatpush.bf16.msrb.mxu0 %v1426_v2 }
 0x35e   : > { %v904_v34 = vadd.f32 %v1549_v30, %v903_v33 }
 0x360   : > { %v906_v35 = vsel %vm905_vm7, %v1549_v30, %v904_v34  ;;  %1088 = vmatpush.bf16.msrb.mxu0 %v1425_v6 }
 0x366   : > { %v845_v11 = vpop.f32.mrf.mxu2 }
 0x367   : > { %v849_v12 = vpack.c.bf16 %v845_v11, %v845_v11  ;;  %v1424_v11 = vld [vmem:[%s2147_s10 + $0x10] sm:$0xff] }
 0x368   : > { %1089 = vmatpush.bf16.msrb.mxu0 %v1424_v11 }
 0x369   : > { %851 = vrot.lane.b32.xlu1 %v849_v12, %s1769_s23  ;;  %s1664_s23 = scalar_lea.hbm %s2190_s12, 32 }
 0x36a   : > { %p1666_p13 = scmp.lt.s32.totalorder %s1664_s23, %s1660_s17 }
 0x36c   : > { %1090 = vmatpush.bf16.msrb.mxu0 %v1423_v14  ;;  %p1667_p0 = por %p1666_p13, %p1665_p12 }
 0x36e   : > { %v847_v13 = vpop.f32.mrf.mxu2  ;;  %p1668_p4 = pnand %p1667_p0, %p1663_p11 }
 0x370   : > { %1091 = vmatpush.bf16.msrb.mxu0 %v1422_v18 }
 0x3db   : > { %v852_v20 = vpop.permute.xlu1 %851 }
 0x3de   : > { %v780_v15 = vpop.f32.mrf.mxu3 }
 0x3df   : > { %v784_v16 = vpack.c.bf16 %v780_v15, %v780_v15 }
 0x3e1   : > { %786 = vrot.lane.b32.xlu0 %v784_v16, %s1770_s18 }
 0x3e6   : > { %v782_v17 = vpop.f32.mrf.mxu3 }
 0x453   : > { %v787_v19 = vpop.permute.xlu0 %786 }
 0x454   : > { %790 = vst.msk [vmem:[#allocation2] sm:$0xf] %vm789_vm4, %v787_v19 }
 0x455   : > { %855 = vst.msk [vmem:[#allocation2] sm:$0xf] %vm854_vm5, %v852_v20 }
 0x45c   : > { %v856_v21 = vld [vmem:[#allocation2] sm:$0xf] }
 0x45d   : > { %1365 = vmatmul.msk.bf16.vlgmr.msra.gmra.mxu1 %vm877_vm6, %v856_v21 }
 0x4da   : > { %v890_v24 = vpop.f32.mrf.mxu1 }
 0x4db   : > { %v891_v25 = vadd.f32 %v1527_v22, %v890_v24 }
 0x4dd   : > { %v2037_v26 = vadd.f32 %v891_v25, %v601_v23 }
 0x4df   : > { %v897_v27 = vsel %vm877_vm6, %v2037_v26, 0.0 }
 0x4e0   : > { %898 = vadd.xlane.f32.xlu2 %v897_v27 }
 0x4e2   : > { %v892_v28 = vpop.f32.mrf.mxu1 }
 0x553   : > { %v899_v36 = vpop.xlane.xlu2 %898 }
 0x554   : > { %v907_v37 = vmul.f32 %v906_v35, %v899_v36 }
 0x556   : > { %v908_v38 = vsub.f32 %v2037_v26, %v907_v37 }
 0x558   : > { %v909_v39 = vmul.f32 %v908_v38, %v908_v38 }
 0x55a   : > { %v910_v40 = vsel %vm877_vm6, %v909_v39, 0.0 }
 0x55b   : > { %911 = vadd.xlane.f32.xlu0 %v910_v40 }
 0x5ce   : > { %v912_v43 = vpop.xlane.xlu0 %911 }
 0x5cf   : > { %v913_v44 = vmul.f32 %v912_v43, %v906_v35 }
 0x5d1   : > { %v914_v45 = vadd.f32 1e-05, %v913_v44 }
 0x5d3   : > { %1550 = vrsqrt.f32 %v914_v45  ;;  %vm921_vm9 = vweird.f32 %v914_v45 }
 0x5d9   : > { %v1551_v46 = vpop.eup %1550 }
 0x5da   : > { %v916_v47 = vmul.f32 %v1551_v46, %v914_v45  ;;  %vm922_vm8 = vweird.f32 %v1551_v46 }
 0x5db   : > { %vm923_vm10 = vmor %vm921_vm9, %vm922_vm8 }
 0x5dc   : > { %v917_v48 = vmul.f32 %v1551_v46, %v916_v47 }
 0x5de   : > { %v918_v49 = vmul.f32 0.5, %v917_v48 }
 0x5e0   : > { %v919_v50 = vsub.f32 1.5, %v918_v49 }
 0x5e2   : > { %v920_v51 = vmul.f32 %v1551_v46, %v919_v50 }
 0x5e4   : > { %v924_v53 = vsel %vm923_vm10, %v1551_v46, %v920_v51 }
 0x5e5   : > { %v925_v54 = vmul.f32 %v924_v53, %v908_v38 }
 0x5e7   : > { %v929_v56 = vmul.f32 %v1528_v52, %v925_v54 }
 0x5e9   : > { %v933_v57 = vadd.f32 %v1529_v55, %v929_v56 }
 0x5eb   : > { %v934_v58 = vpack.c.bf16 %v933_v57, %v933_v57 }
 0x5ed   : > { %1374 = vmatmul.msk.bf16.vlgmr.msra.gmra.mxu3 %vm877_vm6, %v934_v58 }
 0x670   : > { %v967_v62 = vpop.f32.mrf.mxu3 }
 0x671   : > { %v968_v0 = vadd.f32 %v1530_v61, %v967_v62 }
 0x673   : > { %v972_v1 = vmul.f32 0.70710677, %v968_v0  ;;  %v971_v44 = vmul.f32 0.5, %v968_v0 }
 0x675   : > { %v973_v3 = vmul.f32 %v972_v1, %v972_v1 }
 0x677   : > { %v974_v4 = vmin.f32 %v973_v3, 16.0 }
 0x678   : > { %v969_v5 = vpop.f32.mrf.mxu3 }
 0x679   : > { %v975_v7 = vmul.f32 2.1237322e-06, %v974_v4  ;;  %v986_v8 = vmul.f32 3.8918573e-05, %v974_v4 }
 0x67b   : > { %v976_v9 = vadd.f32 0.00028619796, %v975_v7  ;;  %v987_v10 = vadd.f32 0.001143296, %v986_v8 }
 0x67d   : > { %v977_v12 = vmul.f32 %v976_v9, %v974_v4  ;;  %v988_v13 = vmul.f32 %v987_v10, %v974_v4 }
 0x67f   : > { %v989_v15 = vadd.f32 0.014752088, %v988_v13  ;;  %v978_v16 = vadd.f32 0.0036580483, %v977_v12 }
 0x681   : > { %v990_v17 = vmul.f32 %v989_v15, %v974_v4  ;;  %v979_v20 = vmul.f32 %v978_v16, %v974_v4 }
 0x683   : > { %v991_v19 = vadd.f32 0.112945676, %v990_v17  ;;  %v980_v23 = vadd.f32 0.05243302, %v979_v20 }
 0x685   : > { %v992_v21 = vmul.f32 %v991_v19, %v974_v4  ;;  %v981_v27 = vmul.f32 %v980_v23, %v974_v4 }
 0x687   : > { %v993_v22 = vadd.f32 0.4994258, %v992_v21  ;;  %v982_v28 = vadd.f32 0.18741608, %v981_v27 }
 0x689   : > { %v994_v24 = vmul.f32 %v993_v22, %v974_v4  ;;  %v983_v30 = vmul.f32 %v982_v28, %v974_v4 }
 0x68b   : > { %v995_v25 = vadd.f32 1.0, %v994_v24  ;;  %v984_v34 = vadd.f32 1.1283791, %v983_v30 }
 0x68d   : > { %1552 = vrcp.f32 %v995_v25  ;;  %v1007_v33 = vand.u32 2147483648, %v995_v25  ;;  %v1005_v36 = vand.u32 2147483647, %v995_v25  ;;  %vm1001_vm12 = vweird.f32 %v995_v25 }
 0x68e   : > { %v985_v39 = vmul.f32 %v984_v34, %v972_v1 }
 0x68f   : > { %v1008_v38 = vor.u32 1.1754944e-38, %v1007_v33  ;;  %vm1006_vm14 = vcmp.eq.f32.partialorder %v1005_v36, 8.507059e+37 }
 0x693   : > { %v1553_v29 = vpop.eup %1552 }
 0x694   : > { %v997_v31 = vmul.f32 %v1553_v29, %v995_v25  ;;  %vm1002_vm11 = vweird.f32 %v1553_v29 }
 0x695   : > { %vm1003_vm13 = vmor %vm1001_vm12, %vm1002_vm11 }
 0x696   : > { %v998_v32 = vsub.f32 1.0, %v997_v31 }
 0x698   : > { %v999_v35 = vmul.f32 %v1553_v29, %v998_v32 }
 0x69a   : > { %v1000_v37 = vadd.f32 %v1553_v29, %v999_v35 }
 0x69c   : > { %v1004_v40 = vsel %vm1003_vm13, %v1553_v29, %v1000_v37 }
 0x69d   : > { %v1009_v41 = vsel %vm1006_vm14, %v1008_v38, %v1004_v40 }
 0x69e   : > { %v1010_v42 = vmul.f32 %v1009_v41, %v985_v39 }
 0x6a0   : > { %v1375_v43 = vclamps-f32 %v1010_v42, 1.0 }
 0x6a2   : > { %v1013_v45 = vadd.f32 1.0, %v1375_v43 }
 0x6a4   : > { %v1014_v46 = vmul.f32 %v1013_v45, %v971_v44 }
 0x6a6   : > { %v1015_v47 = vpack.c.bf16 %v1014_v46, %v1014_v46 }
 0x6a8   : > { %1092 = vmatmul.bf16.vlgmr.msrb.gmra.mxu0 %v1015_v47 }
 0x6a9   : > { %1671 = shalt.err (!%p1668_p4)
}
 0x6aa   : > { %s1772_s21 = smov 64   ;;  %s1773_s20 = smov 4  }
 0x6ab   : > { %1442 = dma.vmem_to_hbm [thread:$0]  (%p1926_p2), %s1134_s9, 256, %s1136_s14, %s1105_s22, %s1772_s21, %s1772_s21, %s1773_s20  }
 0x6ac   : > { %s1330_s4 = sshll.u32 %s1949_s8, 3  ;;  %s1410_s11 = sshll.u32 %s1754_s28, 3 }
 0x6ad   : > { %s2191_s19 = sld [smem:[#allocation26_spill]]  ;;  %s572_s24 = scalar_lea.vmem [#allocation9], %s1330_s4 }
 0x6ae   : > { %s2192_s16 = sld [smem:[#allocation27_spill]]  ;;  %s1118_s23 = sshll.u32 %s572_s24, 4  ;;  %s1119_s23 = int_to_ptr.vmem [resolvable:$true] %s1118_s23 }
 0x6af   : > { %s1100_s28 = scalar_lea.sflag [#allocation5], %s1949_s8 }
 0x6b3   : > { %v1531_v48 = vld [vmem:[%s2191_s19] ss:$0 sm:$0xff] }
 0x6b4   : > { %s1116_s17 = scalar_lea.hbm %s2192_s16, %s1410_s11  ;;  %s1692_s20 = scalar_lea.hbm %s2192_s16, 16 }
 0x6b5   : > { %s1120_s2 = sshll.u32 %s1116_s17, 4  ;;  %s1121_s2 = int_to_ptr.hbm [resolvable:$true] %s1120_s2 }
 0x6b6   : > { %s1686_s9 = sshra.s32 %s1121_s2, 4  ;;  %s1687_s9 = int_to_ptr.hbm [resolvable:$true] %s1686_s9 }
 0x6b7   : > { %s1688_s14 = scalar_lea.hbm %s1687_s9, 8  ;;  %p1693_p7 = scmp.lt.s32.totalorder %s1687_s9, %s2192_s16 }
 0x6b8   : > { %p1689_p6 = scmp.ne.s32.totalorder %s1687_s9, %s1688_s14  ;;  %p1694_p1 = scmp.lt.s32.totalorder %s1692_s20, %s1688_s14 }
 0x6ba   : > { %p1690_p8 = pnand %p1689_p6, %p1926_p2  ;;  %p1695_p3 = por %p1694_p1, %p1693_p7 }
 0x6bc   : > { %p1691_p9 = pneg %p1690_p8 }
 0x6be   : > { %p1696_p11 = pnand %p1695_p3, %p1691_p9 }
 0x725   : > { %v1093_v49 = vpop.f32.mrf.mxu0 }
 0x726   : > { %v1094_v50 = vadd.f32 %v1531_v48, %v1093_v49 }
 0x728   : > { %v1097_v51 = vadd.f32 %v1094_v50, %v2037_v26 }
 0x72a   : > { %1098 = vst.msk [vmem:[%s572_s24] sm:$0xff] %vm877_vm6, %v1097_v51 }
 0x72b   : > { %1699 = shalt.err (!%p1696_p11)
}
 0x72c   : > { %1441 = dma.vmem_to_hbm [thread:$0]  (%p1926_p2), %s1119_s23, 128, %s1121_s2, %s1100_s28  }
 0x72d   : > { %v1095_v26 = vpop.f32.mrf.mxu0 }
 0x72e PF: > { %s2193_s8 = sld [smem:[#allocation16_spill]]  ;;  %p1457_p12 = pnand %p1322_p10, %p1891_p5 }
 0x730   : > { %p1458_p13 = pneg %p1457_p12 }
 0x734   : > { %s1150_s13 = sand.u32 1, %s2193_s8  }
 0x735   : > { %s1151_s19 = scalar_lea.sflag [#allocation5], %s1150_s13 }
 0x736   : > { %1733 = dma.done.wait (%p1458_p13), %s1151_s19, 128  }
 0x737   : > { %1735 = vsyncadd (%p1458_p13), %s1151_s19, 4294967168  ;;  %s1161_s0 = scalar_lea.sflag [#allocation11], %s1150_s13 }
 0x738   : > { %1737 = dma.done.wait (%p1458_p13), %s1161_s0, 256  }
 0x739   : > { %1739 = vsyncadd (%p1458_p13), %s1161_s0, 4294967040  ;;  %s34_s30 = sadd.s32 1, %s1762_s30   ;;  %s2195_s2 = sld [smem:[#allocation18_spill]] }
 0x73a   : > { %p31_p0 = scmp.ge.s32.totalorder %s34_s30, 4   ;;  %s2196_s25 = smov %s1746_s26 }
 0x73b   : > { %s2197_s26 = smov %s1750_s27  ;;  %s2198_s27 = smov %s1936_s15 }
 0x73c   : > { %s2199_s28 = smov %s1758_s29  ;;  %33 = sbr.rel (!%p31_p0) target bundleno = 19 (0x13), region = 159 }
 0x73f   : > { %s2200_s29 = smov %s2195_s2 }
 0x741   :  { %1167 = vsyncpa [#allocation4], 1 }
 0x742   :  { %1169 = vsyncpa [#allocation4 + $0x1], 1 }
 0x743   :  { %1170 = vsyncpa [#allocation7], 1 }
 0x744   :  { %1171 = vsyncpa [#allocation5], 1 }
 0x745   :  { %1173 = vsyncpa [#allocation5 + $0x1], 1 }
 0x746   :  { %1174 = vsyncpa [#allocation11], 1 }
 0x747   :  { %1176 = vsyncpa [#allocation11 + $0x1], 1 }

</bundles_post_ra>
